<compile_context>
chip_gen: v6e
topology: v6e:2x2x1
jax: 0.10.0
libtpu: 0.0.40
codegen_flags: <defaults>
</compile_context>

<pallas_src>
import functools

import jax
import jax.numpy as jnp
from jax.experimental import pallas as pl
from jax.experimental.pallas import tpu as pltpu


# ----------------------------- Pallas kernel --------------------------------
def _critic_kernel(x_ref, win_ref, bin_ref, w1s_ref, b1s_ref, w2s_ref, b2s_ref,
                   wp_ref, bp_ref, centers_ref, o_ref, *, num_layers):
    # Input arrives f32 straight from HBM; cast to bf16 here (saves a separate
    # wrapper-side HBM cast pass).
    x16 = x_ref[...].astype(jnp.bfloat16)

    # proj_in: (T, d_in) bf16 @ (d_in, dim) bf16 -> f32 accumulate
    h = jnp.dot(x16, win_ref[...], preferred_element_type=jnp.float32) + bin_ref[...]

    # residual MLP blocks (unrolled; num_layers is a trace-time constant)
    for l in range(num_layers):
        h16 = h.astype(jnp.bfloat16)
        a = jnp.dot(h16, w1s_ref[l], preferred_element_type=jnp.float32)
        # bias + ReLU in bf16 (one cast of the dot result; residual stays f32)
        a16 = jnp.maximum(a.astype(jnp.bfloat16) + b1s_ref[l], 0.0)
        h = h + jnp.dot(a16, w2s_ref[l],
                        preferred_element_type=jnp.float32) + b2s_ref[l]

    # value head: logits over HL-Gauss bins
    logits = jnp.dot(h.astype(jnp.bfloat16), wp_ref[...],
                     preferred_element_type=jnp.float32) + bp_ref[...]

    # softmax expectation over bin centers, fused:  E[v] = sum(e*c) / sum(e)
    m = jnp.max(logits, axis=-1, keepdims=True)
    e = jnp.exp(logits - m)
    num = jnp.sum(e * centers_ref[...], axis=-1)      # (tile_rows,)
    den = jnp.sum(e, axis=-1)                         # (tile_rows,)
    vals = num / den

    # lane-dense store: (tile_rows,) -> (1, tile_rows//128, 128)
    o_ref[...] = vals.reshape(o_ref.shape)


# ------------------------------ JAX wrapper ----------------------------------
_DEFAULT_TILE_ROWS = 4096     # large row tiles amortize per-step + weight-push cost


def _cdiv(a, b):
    return -(-a // b)


def _round_up(x, m):
    return _cdiv(x, m) * m


def hl_gauss_bin_centers(min_value, max_value, num_bins):
    support = jnp.linspace(min_value, max_value, num_bins + 1, dtype=jnp.float32)
    return (support[:-1] + support[1:]) * 0.5


@jax.jit
def critic_forward(state, params):
    """Matches Critic.forward(state) -> per-token value prediction (b, n)."""
    w_in, b_in, w1s, b1s, w2s, b2s, w_pred, b_pred, centers = params
    b, n, d_in = state.shape
    num_layers, dim_hidden, dim = w1s.shape
    num_bins = w_pred.shape[0]

    # ---- weight prep (tiny arrays): torch [out, in] -> kernel [in, out] ----
    win_k = jnp.transpose(w_in).astype(jnp.bfloat16)                  # (d_in, dim)
    w1s_k = jnp.transpose(w1s, (0, 2, 1)).astype(jnp.bfloat16)        # (L, dim, dh)
    w2s_k = jnp.transpose(w2s, (0, 2, 1)).astype(jnp.bfloat16)        # (L, dh, dim)
    wp_k = jnp.transpose(w_pred).astype(jnp.bfloat16)                 # (dim, nb)
    bin_k = b_in.astype(jnp.float32)[None, :]                         # (1, dim)
    b1s_k = b1s.astype(jnp.bfloat16)[:, None, :]                      # (L, 1, dh) bf16
    b2s_k = b2s.astype(jnp.float32)[:, None, :]                       # (L, 1, dim)
    bp_k = b_pred.astype(jnp.float32)[None, :]                        # (1, nb)
    centers_k = centers.astype(jnp.float32)[None, :]                  # (1, nb)

    # ---- row tiling: flatten tokens (free reshape), ragged last tile ----
    n_rows = b * n
    x = state.reshape(n_rows, d_in)            # stays f32; cast happens in-kernel

    # tile size: bounded by _DEFAULT_TILE_ROWS, multiple of 128 (lane-dense out),
    # >=2 grid steps whenever n_rows permits (v7x two-TensorCore sharding),
    # and sized so ragged-tile compute waste stays small.
    max_useful_tiles = _cdiv(n_rows, 128)
    num_tiles = min(max(2, _cdiv(n_rows, _DEFAULT_TILE_ROWS)), max_useful_tiles)
    tile_n = _round_up(_cdiv(n_rows, num_tiles), 128)
    num_tiles = _cdiv(n_rows, tile_n)
    grid = (num_tiles,)
    out_sub = tile_n // 128                    # lane-dense output rows per tile

    def resident(arr):   # whole array VMEM-resident across all grid steps
        nd = arr.ndim
        return pl.BlockSpec(arr.shape, lambda i, nd=nd: (0,) * nd)

    total_rows = num_tiles * tile_n
    flops = 2 * total_rows * (d_in * dim + num_layers * 2 * dim * dim_hidden
                              + dim * num_bins)
    bytes_accessed = (n_rows * d_in * 4 + win_k.size * 2 + w1s_k.size * 2
                      + w2s_k.size * 2 + wp_k.size * 2
                      + num_tiles * out_sub * 128 * 4)
    cost = pl.CostEstimate(flops=flops,
                           transcendentals=total_rows * num_bins,
                           bytes_accessed=bytes_accessed)

    out = pl.pallas_call(
        functools.partial(_critic_kernel, num_layers=num_layers),
        out_shape=jax.ShapeDtypeStruct((num_tiles, out_sub, 128), jnp.float32),
        grid=grid,
        in_specs=[
            pl.BlockSpec((tile_n, d_in), lambda i: (i, 0)),           # row-tiled input
            resident(win_k), resident(bin_k),
            resident(w1s_k), resident(b1s_k),
            resident(w2s_k), resident(b2s_k),
            resident(wp_k), resident(bp_k), resident(centers_k),
        ],
        out_specs=pl.BlockSpec((1, out_sub, 128), lambda i: (i, 0, 0)),
        compiler_params=pltpu.CompilerParams(
            dimension_semantics=("parallel",),
            vmem_limit_bytes=32 * 1024 * 1024),
        cost_estimate=cost,
    )(x, win_k, bin_k, w1s_k, b1s_k, w2s_k, b2s_k, wp_k, bp_k, centers_k)

    # garbage rows from the ragged last tile are row-independent; slice them off
    return out.reshape(-1)[:n_rows].reshape(b, n)


# ----------------------------- pure-JAX reference -----------------------------
def _ref_forward(state, params):
    w_in, b_in, w1s, b1s, w2s, b2s, w_pred, b_pred, centers = params
    h = state @ w_in.T + b_in
    for l in range(w1s.shape[0]):
        a = jax.nn.relu(h @ w1s[l].T + b1s[l])
        h = h + a @ w2s[l].T + b2s[l]
    logits = h @ w_pred.T + b_pred
    p = jax.nn.softmax(logits, axis=-1)
    return (p * centers).sum(-1)


# ---------------------------------- main ---------------------------------------
if __name__ == "__main__":
    # small config consistent with Critic(__init__)
    dim_input = 48
    dim = 32
    expansion_factor = 2.0
    num_layers = 4
    dim_hidden = int(expansion_factor * dim)
    num_bins = 32           # hl_gauss_loss_kwargs: min=0.0, max=5.0, num_bins=32
    batch, seq = 2, 8

    key = jax.random.PRNGKey(0)
    keys = jax.random.split(key, 9)
    state = jax.random.normal(keys[0], (batch, seq, dim_input), jnp.float32)

    s = 0.05  # deterministic parameter init (nn.Linear layout: [out, in])
    w_in = jax.random.normal(keys[1], (dim, dim_input), jnp.float32) * s
    b_in = jax.random.normal(keys[2], (dim,), jnp.float32) * s
    w1s = jax.random.normal(keys[3], (num_layers, dim_hidden, dim), jnp.float32) * s
    b1s = jax.random.normal(keys[4], (num_layers, dim_hidden), jnp.float32) * s
    w2s = jax.random.normal(keys[5], (num_layers, dim, dim_hidden), jnp.float32) * s
    b2s = jax.random.normal(keys[6], (num_layers, dim), jnp.float32) * s
    w_pred = jax.random.normal(keys[7], (num_bins, dim), jnp.float32) * s
    b_pred = jax.random.normal(keys[8], (num_bins,), jnp.float32) * s
    centers = hl_gauss_bin_centers(0.0, 5.0, num_bins)
    params = (w_in, b_in, w1s, b1s, w2s, b2s, w_pred, b_pred, centers)

    values = jax.block_until_ready(critic_forward(state, params))

    # sanity check against a pure-JAX f32 reference (kernel runs bf16 matmuls)
    ref = jax.block_until_ready(_ref_forward(state, params))
    assert values.shape == (batch, seq), (values.shape, ref.shape)
    assert jnp.allclose(values, ref, atol=3e-2, rtol=3e-2), \
        float(jnp.max(jnp.abs(values - ref)))

    print("KERNEL_OK")
</pallas_src>

<mosaic_0001>
module attributes {stable_mosaic.version = 11 : i64} {
  func.func @_critic_kernel(%arg0: i32, %arg1: memref<128x48xf32, #tpu.memory_space<vmem>>, %arg2: memref<48x32xbf16, #tpu.memory_space<vmem>>, %arg3: memref<1x32xf32, #tpu.memory_space<vmem>>, %arg4: memref<4x32x64xbf16, #tpu.memory_space<vmem>>, %arg5: memref<4x1x64xbf16, #tpu.memory_space<vmem>>, %arg6: memref<4x64x32xbf16, #tpu.memory_space<vmem>>, %arg7: memref<4x1x32xf32, #tpu.memory_space<vmem>>, %arg8: memref<32x32xbf16, #tpu.memory_space<vmem>>, %arg9: memref<1x32xf32, #tpu.memory_space<vmem>>, %arg10: memref<1x32xf32, #tpu.memory_space<vmem>>, %arg11: memref<1x1x128xf32, #tpu.memory_space<vmem>>) attributes {dimension_semantics = [#tpu.dimension_semantics<parallel>], iteration_bounds = array<i64: 1>, scalar_prefetch = 0 : i64, scratch_operands = 0 : i64, tpu.core_type = #tpu.core_type<tc>, window_params = [{transform_indices = @transform_0, window_bounds = array<i64: 128, 48>}, {pipeline_mode = #tpu.pipeline_mode<synchronous>, transform_indices = @transform_1, window_bounds = array<i64: 48, 32>}, {pipeline_mode = #tpu.pipeline_mode<synchronous>, transform_indices = @transform_2, window_bounds = array<i64: 1, 32>}, {pipeline_mode = #tpu.pipeline_mode<synchronous>, transform_indices = @transform_3, window_bounds = array<i64: 4, 32, 64>}, {pipeline_mode = #tpu.pipeline_mode<synchronous>, transform_indices = @transform_4, window_bounds = array<i64: 4, 1, 64>}, {pipeline_mode = #tpu.pipeline_mode<synchronous>, transform_indices = @transform_5, window_bounds = array<i64: 4, 64, 32>}, {pipeline_mode = #tpu.pipeline_mode<synchronous>, transform_indices = @transform_6, window_bounds = array<i64: 4, 1, 32>}, {pipeline_mode = #tpu.pipeline_mode<synchronous>, transform_indices = @transform_7, window_bounds = array<i64: 32, 32>}, {pipeline_mode = #tpu.pipeline_mode<synchronous>, transform_indices = @transform_8, window_bounds = array<i64: 1, 32>}, {pipeline_mode = #tpu.pipeline_mode<synchronous>, transform_indices = @transform_9, window_bounds = array<i64: 1, 32>}, {transform_indices = @transform_10, window_bounds = array<i64: 1, 1, 128>}]} {
    %c0 = arith.constant 0 : index
    %c0_0 = arith.constant 0 : index
    %0 = vector.load %arg1[%c0, %c0_0] : memref<128x48xf32, #tpu.memory_space<vmem>>, vector<128x48xf32>
    %1 = arith.truncf %0 : vector<128x48xf32> to vector<128x48xbf16>
    %c0_1 = arith.constant 0 : index
    %c0_2 = arith.constant 0 : index
    %2 = vector.load %arg2[%c0_1, %c0_2] : memref<48x32xbf16, #tpu.memory_space<vmem>>, vector<48x32xbf16>
    %cst = arith.constant dense<0.000000e+00> : vector<128x32xf32>
    %3 = tpu.matmul %1, %2, %cst {dimension_numbers = #tpu.dot_dimension_numbers<[1], [0], [0], [1], [0, 0, 1, 1], [], []>} : vector<128x48xbf16>, vector<48x32xbf16>, vector<128x32xf32> -> vector<128x32xf32>
    %c0_3 = arith.constant 0 : index
    %c0_4 = arith.constant 0 : index
    %4 = vector.load %arg3[%c0_3, %c0_4] : memref<1x32xf32, #tpu.memory_space<vmem>>, vector<1x32xf32>
    %5 = vector.broadcast %4 : vector<1x32xf32> to vector<128x32xf32>
    %6 = arith.addf %3, %5 : vector<128x32xf32>
    %7 = arith.truncf %6 : vector<128x32xf32> to vector<128x32xbf16>
    %c0_5 = arith.constant 0 : index
    %c0_6 = arith.constant 0 : index
    %c0_7 = arith.constant 0 : index
    %8 = vector.load %arg4[%c0_5, %c0_6, %c0_7] : memref<4x32x64xbf16, #tpu.memory_space<vmem>>, vector<1x32x64xbf16>
    %9 = vector.shape_cast %8 : vector<1x32x64xbf16> to vector<32x64xbf16>
    %cst_8 = arith.constant dense<0.000000e+00> : vector<128x64xf32>
    %10 = tpu.matmul %7, %9, %cst_8 {dimension_numbers = #tpu.dot_dimension_numbers<[1], [0], [0], [1], [0, 0, 1, 1], [], []>} : vector<128x32xbf16>, vector<32x64xbf16>, vector<128x64xf32> -> vector<128x64xf32>
    %11 = arith.truncf %10 : vector<128x64xf32> to vector<128x64xbf16>
    %c0_9 = arith.constant 0 : index
    %c0_10 = arith.constant 0 : index
    %c0_11 = arith.constant 0 : index
    %12 = vector.load %arg5[%c0_9, %c0_10, %c0_11] : memref<4x1x64xbf16, #tpu.memory_space<vmem>>, vector<1x1x64xbf16>
    %13 = vector.shape_cast %12 : vector<1x1x64xbf16> to vector<1x64xbf16>
    %14 = vector.broadcast %13 : vector<1x64xbf16> to vector<128x64xbf16>
    %15 = arith.addf %11, %14 : vector<128x64xbf16>
    %cst_12 = arith.constant 0.000000e+00 : bf16
    %16 = vector.broadcast %cst_12 : bf16 to vector<128x64xbf16>
    %17 = arith.maximumf %15, %16 : vector<128x64xbf16>
    %c0_13 = arith.constant 0 : index
    %c0_14 = arith.constant 0 : index
    %c0_15 = arith.constant 0 : index
    %18 = vector.load %arg6[%c0_13, %c0_14, %c0_15] : memref<4x64x32xbf16, #tpu.memory_space<vmem>>, vector<1x64x32xbf16>
    %19 = vector.shape_cast %18 : vector<1x64x32xbf16> to vector<64x32xbf16>
    %cst_16 = arith.constant dense<0.000000e+00> : vector<128x32xf32>
    %20 = tpu.matmul %17, %19, %cst_16 {dimension_numbers = #tpu.dot_dimension_numbers<[1], [0], [0], [1], [0, 0, 1, 1], [], []>} : vector<128x64xbf16>, vector<64x32xbf16>, vector<128x32xf32> -> vector<128x32xf32>
    %21 = arith.addf %6, %20 : vector<128x32xf32>
    %c0_17 = arith.constant 0 : index
    %c0_18 = arith.constant 0 : index
    %c0_19 = arith.constant 0 : index
    %22 = vector.load %arg7[%c0_17, %c0_18, %c0_19] : memref<4x1x32xf32, #tpu.memory_space<vmem>>, vector<1x1x32xf32>
    %23 = vector.shape_cast %22 : vector<1x1x32xf32> to vector<1x32xf32>
    %24 = vector.broadcast %23 : vector<1x32xf32> to vector<128x32xf32>
    %25 = arith.addf %21, %24 : vector<128x32xf32>
    %26 = arith.truncf %25 : vector<128x32xf32> to vector<128x32xbf16>
    %c1 = arith.constant 1 : index
    %c0_20 = arith.constant 0 : index
    %c0_21 = arith.constant 0 : index
    %27 = vector.load %arg4[%c1, %c0_20, %c0_21] : memref<4x32x64xbf16, #tpu.memory_space<vmem>>, vector<1x32x64xbf16>
    %28 = vector.shape_cast %27 : vector<1x32x64xbf16> to vector<32x64xbf16>
    %cst_22 = arith.constant dense<0.000000e+00> : vector<128x64xf32>
    %29 = tpu.matmul %26, %28, %cst_22 {dimension_numbers = #tpu.dot_dimension_numbers<[1], [0], [0], [1], [0, 0, 1, 1], [], []>} : vector<128x32xbf16>, vector<32x64xbf16>, vector<128x64xf32> -> vector<128x64xf32>
    %30 = arith.truncf %29 : vector<128x64xf32> to vector<128x64xbf16>
    %c1_23 = arith.constant 1 : index
    %c0_24 = arith.constant 0 : index
    %c0_25 = arith.constant 0 : index
    %31 = vector.load %arg5[%c1_23, %c0_24, %c0_25] : memref<4x1x64xbf16, #tpu.memory_space<vmem>>, vector<1x1x64xbf16>
    %32 = vector.shape_cast %31 : vector<1x1x64xbf16> to vector<1x64xbf16>
    %33 = vector.broadcast %32 : vector<1x64xbf16> to vector<128x64xbf16>
    %34 = arith.addf %30, %33 : vector<128x64xbf16>
    %cst_26 = arith.constant 0.000000e+00 : bf16
    %35 = vector.broadcast %cst_26 : bf16 to vector<128x64xbf16>
    %36 = arith.maximumf %34, %35 : vector<128x64xbf16>
    %c1_27 = arith.constant 1 : index
    %c0_28 = arith.constant 0 : index
    %c0_29 = arith.constant 0 : index
    %37 = vector.load %arg6[%c1_27, %c0_28, %c0_29] : memref<4x64x32xbf16, #tpu.memory_space<vmem>>, vector<1x64x32xbf16>
    %38 = vector.shape_cast %37 : vector<1x64x32xbf16> to vector<64x32xbf16>
    %cst_30 = arith.constant dense<0.000000e+00> : vector<128x32xf32>
    %39 = tpu.matmul %36, %38, %cst_30 {dimension_numbers = #tpu.dot_dimension_numbers<[1], [0], [0], [1], [0, 0, 1, 1], [], []>} : vector<128x64xbf16>, vector<64x32xbf16>, vector<128x32xf32> -> vector<128x32xf32>
    %40 = arith.addf %25, %39 : vector<128x32xf32>
    %c1_31 = arith.constant 1 : index
    %c0_32 = arith.constant 0 : index
    %c0_33 = arith.constant 0 : index
    %41 = vector.load %arg7[%c1_31, %c0_32, %c0_33] : memref<4x1x32xf32, #tpu.memory_space<vmem>>, vector<1x1x32xf32>
    %42 = vector.shape_cast %41 : vector<1x1x32xf32> to vector<1x32xf32>
    %43 = vector.broadcast %42 : vector<1x32xf32> to vector<128x32xf32>
    %44 = arith.addf %40, %43 : vector<128x32xf32>
    %45 = arith.truncf %44 : vector<128x32xf32> to vector<128x32xbf16>
    %c2 = arith.constant 2 : index
    %c0_34 = arith.constant 0 : index
    %c0_35 = arith.constant 0 : index
    %46 = vector.load %arg4[%c2, %c0_34, %c0_35] : memref<4x32x64xbf16, #tpu.memory_space<vmem>>, vector<1x32x64xbf16>
    %47 = vector.shape_cast %46 : vector<1x32x64xbf16> to vector<32x64xbf16>
    %cst_36 = arith.constant dense<0.000000e+00> : vector<128x64xf32>
    %48 = tpu.matmul %45, %47, %cst_36 {dimension_numbers = #tpu.dot_dimension_numbers<[1], [0], [0], [1], [0, 0, 1, 1], [], []>} : vector<128x32xbf16>, vector<32x64xbf16>, vector<128x64xf32> -> vector<128x64xf32>
    %49 = arith.truncf %48 : vector<128x64xf32> to vector<128x64xbf16>
    %c2_37 = arith.constant 2 : index
    %c0_38 = arith.constant 0 : index
    %c0_39 = arith.constant 0 : index
    %50 = vector.load %arg5[%c2_37, %c0_38, %c0_39] : memref<4x1x64xbf16, #tpu.memory_space<vmem>>, vector<1x1x64xbf16>
    %51 = vector.shape_cast %50 : vector<1x1x64xbf16> to vector<1x64xbf16>
    %52 = vector.broadcast %51 : vector<1x64xbf16> to vector<128x64xbf16>
    %53 = arith.addf %49, %52 : vector<128x64xbf16>
    %cst_40 = arith.constant 0.000000e+00 : bf16
    %54 = vector.broadcast %cst_40 : bf16 to vector<128x64xbf16>
    %55 = arith.maximumf %53, %54 : vector<128x64xbf16>
    %c2_41 = arith.constant 2 : index
    %c0_42 = arith.constant 0 : index
    %c0_43 = arith.constant 0 : index
    %56 = vector.load %arg6[%c2_41, %c0_42, %c0_43] : memref<4x64x32xbf16, #tpu.memory_space<vmem>>, vector<1x64x32xbf16>
    %57 = vector.shape_cast %56 : vector<1x64x32xbf16> to vector<64x32xbf16>
    %cst_44 = arith.constant dense<0.000000e+00> : vector<128x32xf32>
    %58 = tpu.matmul %55, %57, %cst_44 {dimension_numbers = #tpu.dot_dimension_numbers<[1], [0], [0], [1], [0, 0, 1, 1], [], []>} : vector<128x64xbf16>, vector<64x32xbf16>, vector<128x32xf32> -> vector<128x32xf32>
    %59 = arith.addf %44, %58 : vector<128x32xf32>
    %c2_45 = arith.constant 2 : index
    %c0_46 = arith.constant 0 : index
    %c0_47 = arith.constant 0 : index
    %60 = vector.load %arg7[%c2_45, %c0_46, %c0_47] : memref<4x1x32xf32, #tpu.memory_space<vmem>>, vector<1x1x32xf32>
    %61 = vector.shape_cast %60 : vector<1x1x32xf32> to vector<1x32xf32>
    %62 = vector.broadcast %61 : vector<1x32xf32> to vector<128x32xf32>
    %63 = arith.addf %59, %62 : vector<128x32xf32>
    %64 = arith.truncf %63 : vector<128x32xf32> to vector<128x32xbf16>
    %c3 = arith.constant 3 : index
    %c0_48 = arith.constant 0 : index
    %c0_49 = arith.constant 0 : index
    %65 = vector.load %arg4[%c3, %c0_48, %c0_49] : memref<4x32x64xbf16, #tpu.memory_space<vmem>>, vector<1x32x64xbf16>
    %66 = vector.shape_cast %65 : vector<1x32x64xbf16> to vector<32x64xbf16>
    %cst_50 = arith.constant dense<0.000000e+00> : vector<128x64xf32>
    %67 = tpu.matmul %64, %66, %cst_50 {dimension_numbers = #tpu.dot_dimension_numbers<[1], [0], [0], [1], [0, 0, 1, 1], [], []>} : vector<128x32xbf16>, vector<32x64xbf16>, vector<128x64xf32> -> vector<128x64xf32>
    %68 = arith.truncf %67 : vector<128x64xf32> to vector<128x64xbf16>
    %c3_51 = arith.constant 3 : index
    %c0_52 = arith.constant 0 : index
    %c0_53 = arith.constant 0 : index
    %69 = vector.load %arg5[%c3_51, %c0_52, %c0_53] : memref<4x1x64xbf16, #tpu.memory_space<vmem>>, vector<1x1x64xbf16>
    %70 = vector.shape_cast %69 : vector<1x1x64xbf16> to vector<1x64xbf16>
    %71 = vector.broadcast %70 : vector<1x64xbf16> to vector<128x64xbf16>
    %72 = arith.addf %68, %71 : vector<128x64xbf16>
    %cst_54 = arith.constant 0.000000e+00 : bf16
    %73 = vector.broadcast %cst_54 : bf16 to vector<128x64xbf16>
    %74 = arith.maximumf %72, %73 : vector<128x64xbf16>
    %c3_55 = arith.constant 3 : index
    %c0_56 = arith.constant 0 : index
    %c0_57 = arith.constant 0 : index
    %75 = vector.load %arg6[%c3_55, %c0_56, %c0_57] : memref<4x64x32xbf16, #tpu.memory_space<vmem>>, vector<1x64x32xbf16>
    %76 = vector.shape_cast %75 : vector<1x64x32xbf16> to vector<64x32xbf16>
    %cst_58 = arith.constant dense<0.000000e+00> : vector<128x32xf32>
    %77 = tpu.matmul %74, %76, %cst_58 {dimension_numbers = #tpu.dot_dimension_numbers<[1], [0], [0], [1], [0, 0, 1, 1], [], []>} : vector<128x64xbf16>, vector<64x32xbf16>, vector<128x32xf32> -> vector<128x32xf32>
    %78 = arith.addf %63, %77 : vector<128x32xf32>
    %c3_59 = arith.constant 3 : index
    %c0_60 = arith.constant 0 : index
    %c0_61 = arith.constant 0 : index
    %79 = vector.load %arg7[%c3_59, %c0_60, %c0_61] : memref<4x1x32xf32, #tpu.memory_space<vmem>>, vector<1x1x32xf32>
    %80 = vector.shape_cast %79 : vector<1x1x32xf32> to vector<1x32xf32>
    %81 = vector.broadcast %80 : vector<1x32xf32> to vector<128x32xf32>
    %82 = arith.addf %78, %81 : vector<128x32xf32>
    %83 = arith.truncf %82 : vector<128x32xf32> to vector<128x32xbf16>
    %c0_62 = arith.constant 0 : index
    %c0_63 = arith.constant 0 : index
    %84 = vector.load %arg8[%c0_62, %c0_63] : memref<32x32xbf16, #tpu.memory_space<vmem>>, vector<32x32xbf16>
    %cst_64 = arith.constant dense<0.000000e+00> : vector<128x32xf32>
    %85 = tpu.matmul %83, %84, %cst_64 {dimension_numbers = #tpu.dot_dimension_numbers<[1], [0], [0], [1], [0, 0, 1, 1], [], []>} : vector<128x32xbf16>, vector<32x32xbf16>, vector<128x32xf32> -> vector<128x32xf32>
    %c0_65 = arith.constant 0 : index
    %c0_66 = arith.constant 0 : index
    %86 = vector.load %arg9[%c0_65, %c0_66] : memref<1x32xf32, #tpu.memory_space<vmem>>, vector<1x32xf32>
    %87 = vector.broadcast %86 : vector<1x32xf32> to vector<128x32xf32>
    %88 = arith.addf %85, %87 : vector<128x32xf32>
    %cst_67 = arith.constant dense<0xFF800000> : vector<128xf32>
    %89 = vector.multi_reduction <maximumf>, %88, %cst_67 [1] : vector<128x32xf32> to vector<128xf32>
    %90 = vector.shape_cast %89 : vector<128xf32> to vector<128x1xf32>
    %91 = vector.broadcast %90 : vector<128x1xf32> to vector<128x32xf32>
    %92 = arith.subf %88, %91 : vector<128x32xf32>
    %93 = math.exp %92 : vector<128x32xf32>
    %c0_68 = arith.constant 0 : index
    %c0_69 = arith.constant 0 : index
    %94 = vector.load %arg10[%c0_68, %c0_69] : memref<1x32xf32, #tpu.memory_space<vmem>>, vector<1x32xf32>
    %95 = vector.broadcast %94 : vector<1x32xf32> to vector<128x32xf32>
    %96 = arith.mulf %93, %95 : vector<128x32xf32>
    %cst_70 = arith.constant dense<0.000000e+00> : vector<128xf32>
    %97 = vector.multi_reduction <add>, %96, %cst_70 [1] : vector<128x32xf32> to vector<128xf32>
    %cst_71 = arith.constant dense<0.000000e+00> : vector<128xf32>
    %98 = vector.multi_reduction <add>, %93, %cst_71 [1] : vector<128x32xf32> to vector<128xf32>
    %99 = arith.divf %97, %98 : vector<128xf32>
    %100 = vector.shape_cast %99 : vector<128xf32> to vector<1x1x128xf32>
    %c0_72 = arith.constant 0 : index
    %c0_73 = arith.constant 0 : index
    %c0_74 = arith.constant 0 : index
    %101 = vector.load %arg11[%c0_72, %c0_73, %c0_74] : memref<1x1x128xf32, #tpu.memory_space<vmem>>, vector<1x1x128xf32>
    tpu.vector_store %arg11[%c0_72, %c0_73, %c0_74], %100 {strides = array<i32>} : memref<1x1x128xf32, #tpu.memory_space<vmem>>, vector<1x1x128xf32>,
    return
  }
  func.func @transform_0(%arg0: i32) -> (i32, i32) {
    %c0_i32 = arith.constant 0 : i32
    %c0_i32_0 = arith.constant 0 : i32
    return %arg0, %c0_i32 : i32, i32
  }
  func.func @transform_1(%arg0: i32) -> (i32, i32) {
    %c0_i32 = arith.constant 0 : i32
    %c0_i32_0 = arith.constant 0 : i32
    %c0_i32_1 = arith.constant 0 : i32
    return %c0_i32, %c0_i32_0 : i32, i32
  }
  func.func @transform_2(%arg0: i32) -> (i32, i32) {
    %c0_i32 = arith.constant 0 : i32
    %c0_i32_0 = arith.constant 0 : i32
    %c0_i32_1 = arith.constant 0 : i32
    return %c0_i32, %c0_i32_0 : i32, i32
  }
  func.func @transform_3(%arg0: i32) -> (i32, i32, i32) {
    %c0_i32 = arith.constant 0 : i32
    %c0_i32_0 = arith.constant 0 : i32
    %c0_i32_1 = arith.constant 0 : i32
    %c0_i32_2 = arith.constant 0 : i32
    return %c0_i32, %c0_i32_0, %c0_i32_1 : i32, i32, i32
  }
  func.func @transform_4(%arg0: i32) -> (i32, i32, i32) {
    %c0_i32 = arith.constant 0 : i32
    %c0_i32_0 = arith.constant 0 : i32
    %c0_i32_1 = arith.constant 0 : i32
    %c0_i32_2 = arith.constant 0 : i32
    return %c0_i32, %c0_i32_0, %c0_i32_1 : i32, i32, i32
  }
  func.func @transform_5(%arg0: i32) -> (i32, i32, i32) {
    %c0_i32 = arith.constant 0 : i32
    %c0_i32_0 = arith.constant 0 : i32
    %c0_i32_1 = arith.constant 0 : i32
    %c0_i32_2 = arith.constant 0 : i32
    return %c0_i32, %c0_i32_0, %c0_i32_1 : i32, i32, i32
  }
  func.func @transform_6(%arg0: i32) -> (i32, i32, i32) {
    %c0_i32 = arith.constant 0 : i32
    %c0_i32_0 = arith.constant 0 : i32
    %c0_i32_1 = arith.constant 0 : i32
    %c0_i32_2 = arith.constant 0 : i32
    return %c0_i32, %c0_i32_0, %c0_i32_1 : i32, i32, i32
  }
  func.func @transform_7(%arg0: i32) -> (i32, i32) {
    %c0_i32 = arith.constant 0 : i32
    %c0_i32_0 = arith.constant 0 : i32
    %c0_i32_1 = arith.constant 0 : i32
    return %c0_i32, %c0_i32_0 : i32, i32
  }
  func.func @transform_8(%arg0: i32) -> (i32, i32) {
    %c0_i32 = arith.constant 0 : i32
    %c0_i32_0 = arith.constant 0 : i32
    %c0_i32_1 = arith.constant 0 : i32
    return %c0_i32, %c0_i32_0 : i32, i32
  }
  func.func @transform_9(%arg0: i32) -> (i32, i32) {
    %c0_i32 = arith.constant 0 : i32
    %c0_i32_0 = arith.constant 0 : i32
    %c0_i32_1 = arith.constant 0 : i32
    return %c0_i32, %c0_i32_0 : i32, i32
  }
  func.func @transform_10(%arg0: i32) -> (i32, i32, i32) {
    %c0_i32 = arith.constant 0 : i32
    %c0_i32_0 = arith.constant 0 : i32
    %c0_i32_1 = arith.constant 0 : i32
    return %arg0, %c0_i32, %c0_i32_0 : i32, i32, i32
  }
}

</mosaic_0001>

<bundles_post_ra>
// kernel: critic_forward.1
= control target key start
LH: loop header
LB: loop body
LE: loop exit
PB: predicated region body
PF: predicated region fallthrough
CT: control target
= control target key end

     0   :  { %vm91_vm0 = vcmask 392192   ;;  %vm237_vm1 = vcmask 261120   ;;  %vm423_vm2 = vcmask 523264   ;;  %vm2129_vm3 = vcmask 130112   ;;  %s3592_s1 = inlined_call_operand.vmem [shape: bf16[48,32], index: 1, kind: input, shape index: {}]   ;;  %s3593_s0 = inlined_call_operand.vmem [shape: f32[16,48], index: 0, kind: input, shape index: {}]   ;;  %s3594_s3 = inlined_call_operand.vmem [shape: bf16[4,32,64], index: 3, kind: input, shape index: {}]   ;;  %s3595_s5 = inlined_call_operand.vmem [shape: bf16[4,64,32], index: 5, kind: input, shape index: {}]   ;;  %s3596_s2 = inlined_call_operand.vmem [shape: f32[1,32], index: 2, kind: input, shape index: {}]   ;;  %s3597_s4 = inlined_call_operand.vmem [shape: bf16[4,1,64], index: 4, kind: input, shape index: {}]   ;;  %s3598_s6 = inlined_call_operand.vmem [shape: f32[4,1,32], index: 6, kind: input, shape index: {}]   ;;  %s3599_s7 = inlined_call_operand.vmem [shape: bf16[32,32], index: 7, kind: input, shape index: {}]   ;;  %s3600_s8 = inlined_call_operand.vmem [shape: f32[1,32], index: 8, kind: input, shape index: {}]   ;;  %s3601_s9 = inlined_call_operand.vmem [shape: f32[1,32], index: 9, kind: input, shape index: {}]   ;;  %s3602_s10 = inlined_call_operand.vmem [shape: f32[1,1,128], index: 10, kind: output, shape index: {}]  }
   0x1   :  { %v2721_v0 = vld [vmem:[%s3592_s1 + $0x10] sm:$0xff]   ;;  %v2722_v1 = vld [vmem:[%s3592_s1 + $0x8] sm:$0xff]   ;;  %v36_v2 = vld [vmem:[%s3593_s0] sm:$0xff]  ;;  %vm2136_vm4 = vcmask 195712   ;;  %vm2143_vm5 = vcmask 261312   ;;  %vm2150_vm6 = vcmask 326912  }
   0x2   :  { %2502 = vmatprep.subr.bf16.mxu0 %v2721_v0  ;;  %v37_v3 = vld [vmem:[%s3593_s0 + $0x8] sm:$0xff]  ;;  %v2723_v4 = vld [vmem:[%s3592_s1] sm:$0xff]   ;;  %v38_v6 = vld [vmem:[%s3593_s0 + $0x10] sm:$0xff]  ;;  %vm2157_vm7 = vcmask 392512   ;;  %vm2164_vm8 = vcmask 458112   ;;  %vm2171_vm9 = vcmask 523712  }
   0x3   :  { %2503 = vmatpush3.bf16.msra.mxu0 %v2721_v0  ;;  %v52_v5 = vpack.c.bf16 %v37_v3, %v36_v2  ;;  %v39_v7 = vld [vmem:[%s3593_s0 + $0x18] sm:$0xff]  ;;  %v40_v8 = vld [vmem:[%s3593_s0 + $0x20] sm:$0xff]  ;;  %v41_v9 = vld [vmem:[%s3593_s0 + $0x28] sm:$0xff]  ;;  %vm2178_vm10 = vcmask 589312   ;;  %vm2185_vm11 = vcmask 654912   ;;  %vm2192_vm12 = vcmask 720512  }
   0x4   :  { %2504 = vmatprep.subr.bf16.mxu0 %v2722_v1  ;;  %v53_v10 = vpack.c.bf16 %v39_v7, %v38_v6  ;;  %v54_v11 = vpack.c.bf16 %v41_v9, %v40_v8  ;;  %v42_v12 = vld [vmem:[%s3593_s0 + $0x30] sm:$0xff]  ;;  %v43_v13 = vld [vmem:[%s3593_s0 + $0x38] sm:$0xff]  ;;  %v44_v14 = vld [vmem:[%s3593_s0 + $0x40] sm:$0xff]  ;;  %vm2199_vm13 = vcmask 786112   ;;  %vm2206_vm14 = vcmask 851712  }
   0x5   :  { %2508 = vmatprep.mubr.msk.bf16.mxu0 %vm91_vm0, %v52_v5  ;;  %v45_v15 = vld [vmem:[%s3593_s0 + $0x48] sm:$0xff]  ;;  %v55_v16 = vpack.c.bf16 %v43_v13, %v42_v12  ;;  %v46_v18 = vld [vmem:[%s3593_s0 + $0x50] sm:$0xff]  ;;  %v47_v19 = vld [vmem:[%s3593_s0 + $0x58] sm:$0xff]  ;;  %v371_v12 = vlaneseq  ;;  %vm2213_vm15 = vcmask 917312  }
   0x6   :  { %v56_v17 = vpack.c.bf16 %v45_v15, %v44_v14  ;;  %v48_v20 = vld [vmem:[%s3593_s0 + $0x60] sm:$0xff]  ;;  %v49_v21 = vld [vmem:[%s3593_s0 + $0x68] sm:$0xff]  ;;  %v57_v22 = vpack.c.bf16 %v47_v19, %v46_v18  ;;  %v50_v24 = vld [vmem:[%s3593_s0 + $0x70] sm:$0xff] }
   0x7   :  { %2505 = vmatpush3.bf16.msra.mxu0 %v2722_v1  ;;  %v58_v23 = vpack.c.bf16 %v49_v21, %v48_v20  ;;  %v51_v25 = vld [vmem:[%s3593_s0 + $0x78] sm:$0xff]  ;;  %v2724_v27 = vld [vmem:[%s3594_s3 + $0x8] sm:$0xff]   ;;  %v2725_v28 = vld [vmem:[%s3594_s3] sm:$0xff]   ;;  %v3019_v13 = vshrl.u32 %v371_v12, 7 }
   0x8   :  { %2506 = vmatprep.subr.bf16.mxu0 %v2723_v4  ;;  %v59_v26 = vpack.c.bf16 %v51_v25, %v50_v24  ;;  %2524 = vmatprep.subr.bf16.mxu1 %v2724_v27  ;;  %v2726_v29 = vld [vmem:[%s3595_s5 + $0x18] sm:$0xff]   ;;  %v2235_v33 = vld [vmem:[%s3596_s2] ss:$0 sm:$0xff]  ;;  %v2727_v43 = vld [vmem:[%s3595_s5 + $0x10] sm:$0xff]  }
   0x9   :  { %2525 = vmatpush3.bf16.msra.mxu1 %v2724_v27  ;;  %v2728_v49 = vld [vmem:[%s3595_s5 + $0x8] sm:$0xff]   ;;  %v2729_v9 = vld [vmem:[%s3595_s5] sm:$0xff]  }
   0xa   :  { %2526 = vmatprep.subr.bf16.mxu1 %v2725_v28  ;;  %v367_v14 = vld [vmem:[%s3597_s4] sm:$0x1] }
   0xb   :  { %2507 = vmatpush3.bf16.msra.mxu0 %v2723_v4 }
   0xd   :  { %2527 = vmatpush3.bf16.msra.mxu1 %v2725_v28  ;;  %v2814_v28 = vmov 0  }
   0xe   :  { %2509 = vmatmul.mubr.msk.bf16.vlgmr.msra.gmra.mxu0 %vm91_vm0, %v53_v10  ;;  %2544 = vmatprep.subr.bf16.mxu1 %v2726_v29  ;;  %v2730_v10 = vld [vmem:[%s3594_s3 + $0x18] sm:$0xff]  }
   0xf   :  { %2512 = vmatprep.mubr.msk.bf16.mxu0 %vm91_vm0, %v54_v11  ;;  %v2731_v11 = vld [vmem:[%s3594_s3 + $0x10] sm:$0xff]   ;;  %2568 = vmatprep.subr.bf16.mxu0 %v2730_v10 }
  0x10   :  { %2569 = vmatpush3.bf16.msra.mxu0 %v2730_v10 }
  0x11   :  { %2570 = vmatprep.subr.bf16.mxu0 %v2731_v11 }
  0x14   :  { %2571 = vmatpush3.bf16.msra.mxu0 %v2731_v11  ;;  %v2732_v11 = vld [vmem:[%s3595_s5 + $0x38] sm:$0xff]  }
  0x16   :  { %2513 = vmatmul.mubr.msk.bf16.gmra.mxu0 %vm91_vm0, %v55_v16  ;;  %v369_v16 = vpack.i.b16 %v367_v14, %v367_v14  ;;  %v2733_v14 = vld [vmem:[%s3595_s5 + $0x30] sm:$0xff]  }
  0x17   :  { %2516 = vmatprep.mubr.msk.bf16.mxu0 %vm91_vm0, %v56_v17  ;;  %v3025_v17 = vsub.s32 0, %v3019_v13 }
  0x19   :  { %v374_v20 = vrot.slane %v369_v16, %v3025_v17 }
  0x1e   :  { %2517 = vmatmul.mubr.msk.bf16.gmra.mxu0 %vm91_vm0, %v57_v22 }
  0x1f   :  { %2520 = vmatprep.mubr.msk.bf16.mxu0 %vm91_vm0, %v58_v23 }
  0x26   :  { %2521 = vmatmul.mubr.msk.bf16.gmra.mxu0 %vm91_vm0, %v59_v26  ;;  %vm2220_vm0 = vcmask 982912  }
  0xce   :  { %v2510_v30 = vpop.f32.mrf.mxu0 }
  0xcf   :  { %v2953_v38 = vadd.f32 %v2510_v30, %v2235_v33 }
  0xd0   :  { %v150_v31 = vpop.f32.mrf.mxu0 }
  0xd1   :  { %v2949_v36 = vadd.f32 %v2235_v33, %v150_v31 }
  0xd2   :  { %v2511_v32 = vpop.f32.mrf.mxu0 }
  0xd3   :  { %v2947_v34 = vadd.f32 %v2511_v32, %v2235_v33 }
  0xd4   :  { %v153_v35 = vpop.f32.mrf.mxu0 }
  0xd5   :  { %v2951_v37 = vadd.f32 %v2235_v33, %v153_v35  ;;  %v214_v41 = vpack.c.bf16 %v2947_v34, %v2953_v38 }
  0xd6   :  { %v2514_v39 = vpop.f32.mrf.mxu0 }
  0xd7   :  { %v213_v40 = vpack.c.bf16 %v2951_v37, %v2949_v36  ;;  %v2963_v44 = vadd.f32 %v2514_v39, %v2235_v33 }
  0xd8   :  { %v166_v42 = vpop.f32.mrf.mxu0 }
  0xd9   :  { %2528 = vmatprep.mubr.msk.bf16.mxu1 %vm237_vm1, %v213_v40  ;;  %v2966_v46 = vadd.f32 %v2235_v33, %v166_v42 }
  0xda   :  { %v2515_v45 = vpop.f32.mrf.mxu0  ;;  %2529 = vmatmul.mubr.msk.bf16.vlgmr.msra.gmra.mxu1 %vm237_vm1, %v214_v41 }
  0xdb   :  { %v2968_v47 = vadd.f32 %v2515_v45, %v2235_v33  ;;  %2545 = vmatpush3.bf16.msra.mxu1 %v2726_v29 }
  0xdc   :  { %v169_v48 = vpop.f32.mrf.mxu0  ;;  %2546 = vmatprep.subr.bf16.mxu1 %v2727_v43 }
  0xdd   :  { %v2973_v50 = vadd.f32 %v2235_v33, %v169_v48  ;;  %v216_v51 = vpack.c.bf16 %v2968_v47, %v2963_v44 }
  0xde   :  { %v2518_v52 = vpop.f32.mrf.mxu0 }
  0xdf   :  { %v215_v53 = vpack.c.bf16 %v2973_v50, %v2966_v46  ;;  %2547 = vmatpush3.bf16.msra.mxu1 %v2727_v43  ;;  %v2980_v55 = vadd.f32 %v2518_v52, %v2235_v33 }
  0xe0   :  { %v182_v54 = vpop.f32.mrf.mxu0  ;;  %2548 = vmatprep.subr.bf16.mxu1 %v2728_v49 }
  0xe1   :  { %2532 = vmatprep.mubr.msk.bf16.mxu1 %vm237_vm1, %v215_v53  ;;  %v2983_v57 = vadd.f32 %v2235_v33, %v182_v54 }
  0xe2   :  { %v2519_v56 = vpop.f32.mrf.mxu0  ;;  %2533 = vmatmul.mubr.msk.bf16.gmra.mxu1 %vm237_vm1, %v216_v51 }
  0xe3   :  { %v2985_v58 = vadd.f32 %v2519_v56, %v2235_v33  ;;  %2549 = vmatpush3.bf16.msra.mxu1 %v2728_v49 }
  0xe4   :  { %v185_v59 = vpop.f32.mrf.mxu0  ;;  %2550 = vmatprep.subr.bf16.mxu1 %v2729_v9 }
  0xe5   :  { %v2987_v60 = vadd.f32 %v2235_v33, %v185_v59  ;;  %v218_v61 = vpack.c.bf16 %v2985_v58, %v2980_v55 }
  0xe6   :  { %v2522_v62 = vpop.f32.mrf.mxu0 }
  0xe7   :  { %v217_v63 = vpack.c.bf16 %v2987_v60, %v2983_v57  ;;  %v2994_v1 = vadd.f32 %v2522_v62, %v2235_v33  ;;  %2551 = vmatpush3.bf16.msra.mxu1 %v2729_v9 }
  0xe8   :  { %v198_v0 = vpop.f32.mrf.mxu0  ;;  %2588 = vmatprep.subr.bf16.mxu1 %v2732_v11 }
  0xe9   :  { %2536 = vmatprep.mubr.msk.bf16.mxu1 %vm237_vm1, %v217_v63  ;;  %v2997_v3 = vadd.f32 %v2235_v33, %v198_v0 }
  0xea   :  { %v2523_v2 = vpop.f32.mrf.mxu0  ;;  %2537 = vmatmul.mubr.msk.bf16.gmra.mxu1 %vm237_vm1, %v218_v61 }
  0xeb   :  { %v2999_v4 = vadd.f32 %v2523_v2, %v2235_v33 }
  0xec   :  { %v201_v5 = vpop.f32.mrf.mxu0 }
  0xed   :  { %v3001_v6 = vadd.f32 %v2235_v33, %v201_v5  ;;  %v220_v7 = vpack.c.bf16 %v2999_v4, %v2994_v1 }
  0xef   :  { %v219_v8 = vpack.c.bf16 %v3001_v6, %v2997_v3 }
  0xf1   :  { %2540 = vmatprep.mubr.msk.bf16.mxu1 %vm237_vm1, %v219_v8 }
  0xf2   :  { %2541 = vmatmul.mubr.msk.bf16.gmra.mxu1 %vm237_vm1, %v220_v7 }
 0x19a   :  { %v2530_v15 = vpop.f32.mrf.mxu1 }
 0x19c   :  { %v296_v18 = vpop.f32.mrf.mxu1 }
 0x19e   :  { %v2531_v19 = vpop.f32.mrf.mxu1 }
 0x19f   :  { %v360_v21 = vpack.c.bf16 %v2531_v19, %v2530_v15  ;;  %v2734_v15 = vld [vmem:[%s3595_s5 + $0x28] sm:$0xff]  }
 0x1a0   :  { %v299_v22 = vpop.f32.mrf.mxu1 }
 0x1a1   :  { %v359_v23 = vpack.c.bf16 %v299_v22, %v296_v18  ;;  %v376_v24 = vadd.bf16 %v374_v20, %v360_v21 }
 0x1a2   :  { %v2534_v25 = vpop.f32.mrf.mxu1 }
 0x1a3   :  { %v375_v26 = vadd.bf16 %v374_v20, %v359_v23  ;;  %v384_v30 = vmax.bf16 %v2814_v28, %v376_v24  ;;  %v2269_v24 = vld [vmem:[%s3598_s6] ss:$0 sm:$0xff] }
 0x1a4   :  { %v312_v27 = vpop.f32.mrf.mxu1 }
 0x1a5   :  { %v383_v29 = vmax.bf16 %v2814_v28, %v375_v26 }
 0x1a6   :  { %v2535_v31 = vpop.f32.mrf.mxu1 }
 0x1a7   :  { %v362_v32 = vpack.c.bf16 %v2535_v31, %v2534_v25  ;;  %2552 = vmatprep.mubr.msk.bf16.mxu1 %vm423_vm2, %v383_v29 }
 0x1a8   :  { %v315_v33 = vpop.f32.mrf.mxu1  ;;  %2553 = vmatmul.mubr.msk.bf16.vlgmr.msra.gmra.mxu1 %vm423_vm2, %v384_v30 }
 0x1a9   :  { %v361_v35 = vpack.c.bf16 %v315_v33, %v312_v27  ;;  %v378_v39 = vadd.bf16 %v374_v20, %v362_v32  ;;  %2589 = vmatpush3.bf16.msra.mxu1 %v2732_v11 }
 0x1aa   :  { %v2538_v40 = vpop.f32.mrf.mxu1  ;;  %2590 = vmatprep.subr.bf16.mxu1 %v2733_v14 }
 0x1ab   :  { %v377_v41 = vadd.bf16 %v374_v20, %v361_v35  ;;  %v386_v45 = vmax.bf16 %v2814_v28, %v378_v39 }
 0x1ac   :  { %v328_v42 = vpop.f32.mrf.mxu1 }
 0x1ad   :  { %v385_v43 = vmax.bf16 %v2814_v28, %v377_v41  ;;  %2591 = vmatpush3.bf16.msra.mxu1 %v2733_v14 }
 0x1ae   :  { %v2539_v48 = vpop.f32.mrf.mxu1  ;;  %2592 = vmatprep.subr.bf16.mxu1 %v2734_v15 }
 0x1af   :  { %v364_v49 = vpack.c.bf16 %v2539_v48, %v2538_v40  ;;  %2556 = vmatprep.mubr.msk.bf16.mxu1 %vm423_vm2, %v385_v43 }
 0x1b0   :  { %v331_v51 = vpop.f32.mrf.mxu1  ;;  %2557 = vmatmul.mubr.msk.bf16.gmra.mxu1 %vm423_vm2, %v386_v45 }
 0x1b1   :  { %v363_v52 = vpack.c.bf16 %v331_v51, %v328_v42  ;;  %v380_v53 = vadd.bf16 %v374_v20, %v364_v49  ;;  %2593 = vmatpush3.bf16.msra.mxu1 %v2734_v15  ;;  %v2737_v15 = vld [vmem:[%s3594_s3 + $0x20] sm:$0xff]  }
 0x1b2   :  { %v2542_v54 = vpop.f32.mrf.mxu1 }
 0x1b3   :  { %v379_v56 = vadd.bf16 %v374_v20, %v363_v52  ;;  %v388_v62 = vmax.bf16 %v2814_v28, %v380_v53 }
 0x1b4   :  { %v344_v59 = vpop.f32.mrf.mxu1 }
 0x1b5   :  { %v387_v61 = vmax.bf16 %v2814_v28, %v379_v56 }
 0x1b6   :  { %v2543_v63 = vpop.f32.mrf.mxu1 }
 0x1b7   :  { %v366_v0 = vpack.c.bf16 %v2543_v63, %v2542_v54  ;;  %2560 = vmatprep.mubr.msk.bf16.mxu1 %vm423_vm2, %v387_v61 }
 0x1b8   :  { %v347_v2 = vpop.f32.mrf.mxu1  ;;  %2561 = vmatmul.mubr.msk.bf16.gmra.mxu1 %vm423_vm2, %v388_v62 }
 0x1b9   :  { %v365_v5 = vpack.c.bf16 %v347_v2, %v344_v59  ;;  %v382_v7 = vadd.bf16 %v374_v20, %v366_v0 }
 0x1bb   :  { %v381_v8 = vadd.bf16 %v374_v20, %v365_v5  ;;  %v390_v10 = vmax.bf16 %v2814_v28, %v382_v7 }
 0x1bd   :  { %v389_v9 = vmax.bf16 %v2814_v28, %v381_v8 }
 0x1bf   :  { %2564 = vmatprep.mubr.msk.bf16.mxu1 %vm423_vm2, %v389_v9 }
 0x1c0   :  { %2565 = vmatmul.mubr.msk.bf16.gmra.mxu1 %vm423_vm2, %v390_v10 }
 0x268   :  { %v2554_v16 = vpop.f32.mrf.mxu1 }
 0x269   :  { %v547_v22 = vadd.f32 %v2554_v16, %v2953_v38  ;;  %v2284_v16 = vld [vmem:[%s3597_s4 + $0x1] sm:$0x1] }
 0x26a   :  { %v482_v18 = vpop.f32.mrf.mxu1 }
 0x26b   :  { %v545_v20 = vadd.f32 %v482_v18, %v2949_v36  ;;  %v3066_v31 = vadd.f32 %v2269_v24, %v547_v22 }
 0x26c   :  { %v2555_v19 = vpop.f32.mrf.mxu1 }
 0x26d   :  { %v548_v21 = vadd.f32 %v2555_v19, %v2947_v34  ;;  %v3062_v29 = vadd.f32 %v2269_v24, %v545_v20  ;;  %v741_v19 = vpack.i.b16 %v2284_v16, %v2284_v16  ;;  %v2739_v16 = vld [vmem:[%s3595_s5 + $0x50] sm:$0xff]  }
 0x26e   :  { %v485_v23 = vpop.f32.mrf.mxu1 }
 0x26f   :  { %v546_v25 = vadd.f32 %v485_v23, %v2951_v37  ;;  %v3060_v26 = vadd.f32 %v2269_v24, %v548_v21  ;;  %v746_v22 = vrot.slane %v741_v19, %v3025_v17 }
 0x270   :  { %v2558_v27 = vpop.f32.mrf.mxu1 }
 0x271   :  { %v3064_v30 = vadd.f32 %v2269_v24, %v546_v25  ;;  %v585_v38 = vpack.c.bf16 %v3060_v26, %v3066_v31  ;;  %v551_v35 = vadd.f32 %v2558_v27, %v2963_v44 }
 0x272   :  { %v498_v36 = vpop.f32.mrf.mxu1 }
 0x273   :  { %v584_v34 = vpack.c.bf16 %v3064_v30, %v3062_v29  ;;  %v549_v33 = vadd.f32 %v498_v36, %v2966_v46  ;;  %v3084_v48 = vadd.f32 %v2269_v24, %v551_v35 }
 0x274   :  { %v2559_v32 = vpop.f32.mrf.mxu1 }
 0x275   :  { %v552_v37 = vadd.f32 %v2559_v32, %v2968_v47  ;;  %2572 = vmatprep.mubr.msk.bf16.mxu0 %vm237_vm1, %v584_v34  ;;  %v3080_v43 = vadd.f32 %v2269_v24, %v549_v33 }
 0x276   :  { %v501_v39 = vpop.f32.mrf.mxu1  ;;  %2573 = vmatmul.mubr.msk.bf16.vlgmr.msra.gmra.mxu0 %vm237_vm1, %v585_v38 }
 0x277   :  { %v550_v40 = vadd.f32 %v501_v39, %v2973_v50  ;;  %v3078_v41 = vadd.f32 %v2269_v24, %v552_v37 }
 0x278   :  { %v2562_v42 = vpop.f32.mrf.mxu1 }
 0x279   :  { %v3082_v45 = vadd.f32 %v2269_v24, %v550_v40  ;;  %v587_v44 = vpack.c.bf16 %v3078_v41, %v3084_v48  ;;  %v555_v52 = vadd.f32 %v2562_v42, %v2980_v55 }
 0x27a   :  { %v514_v46 = vpop.f32.mrf.mxu1 }
 0x27b   :  { %v586_v47 = vpack.c.bf16 %v3082_v45, %v3080_v43  ;;  %v553_v51 = vadd.f32 %v514_v46, %v2983_v57  ;;  %v3102_v63 = vadd.f32 %v2269_v24, %v555_v52 }
 0x27c   :  { %v2563_v49 = vpop.f32.mrf.mxu1 }
 0x27d   :  { %v556_v50 = vadd.f32 %v2563_v49, %v2985_v58  ;;  %2576 = vmatprep.mubr.msk.bf16.mxu0 %vm237_vm1, %v586_v47  ;;  %v3098_v61 = vadd.f32 %v2269_v24, %v553_v51 }
 0x27e   :  { %v517_v53 = vpop.f32.mrf.mxu1  ;;  %2577 = vmatmul.mubr.msk.bf16.gmra.mxu0 %vm237_vm1, %v587_v44 }
 0x27f   :  { %v554_v54 = vadd.f32 %v517_v53, %v2987_v60  ;;  %v3096_v56 = vadd.f32 %v2269_v24, %v556_v50 }
 0x280   :  { %v2566_v59 = vpop.f32.mrf.mxu1 }
 0x281   :  { %v3100_v62 = vadd.f32 %v2269_v24, %v554_v54  ;;  %v589_v55 = vpack.c.bf16 %v3096_v56, %v3102_v63  ;;  %v559_v5 = vadd.f32 %v2566_v59, %v2994_v1  ;;  %v2735_v1 = vld [vmem:[%s3595_s5 + $0x20] sm:$0xff]  }
 0x282   :  { %v530_v57 = vpop.f32.mrf.mxu1  ;;  %2594 = vmatprep.subr.bf16.mxu1 %v2735_v1 }
 0x283   :  { %v588_v58 = vpack.c.bf16 %v3100_v62, %v3098_v61  ;;  %v557_v2 = vadd.f32 %v530_v57, %v2997_v3  ;;  %v3120_v14 = vadd.f32 %v2269_v24, %v559_v5  ;;  %2595 = vmatpush3.bf16.msra.mxu1 %v2735_v1 }
 0x284   :  { %v2567_v0 = vpop.f32.mrf.mxu1 }
 0x285   :  { %v560_v60 = vadd.f32 %v2567_v0, %v2999_v4  ;;  %2580 = vmatprep.mubr.msk.bf16.mxu0 %vm237_vm1, %v588_v58  ;;  %v3116_v10 = vadd.f32 %v2269_v24, %v557_v2 }
 0x286   :  { %v533_v7 = vpop.f32.mrf.mxu1  ;;  %2581 = vmatmul.mubr.msk.bf16.gmra.mxu0 %vm237_vm1, %v589_v55 }
 0x287   :  { %v558_v8 = vadd.f32 %v533_v7, %v3001_v6  ;;  %v3114_v9 = vadd.f32 %v2269_v24, %v560_v60  ;;  %v2736_v6 = vld [vmem:[%s3594_s3 + $0x28] sm:$0xff]  }
 0x288   :  { %2612 = vmatprep.subr.bf16.mxu0 %v2736_v6 }
 0x289   :  { %v3118_v11 = vadd.f32 %v2269_v24, %v558_v8  ;;  %v591_v4 = vpack.c.bf16 %v3114_v9, %v3120_v14  ;;  %2613 = vmatpush3.bf16.msra.mxu0 %v2736_v6 }
 0x28a   :  { %2614 = vmatprep.subr.bf16.mxu0 %v2737_v15 }
 0x28b   :  { %v590_v3 = vpack.c.bf16 %v3118_v11, %v3116_v10 }
 0x28d   :  { %2584 = vmatprep.mubr.msk.bf16.mxu0 %vm237_vm1, %v590_v3  ;;  %2615 = vmatpush3.bf16.msra.mxu0 %v2737_v15  ;;  %v2738_v15 = vld [vmem:[%s3595_s5 + $0x58] sm:$0xff]  }
 0x28e   :  { %2585 = vmatmul.mubr.msk.bf16.gmra.mxu0 %vm237_vm1, %v591_v4  ;;  %2632 = vmatprep.subr.bf16.mxu1 %v2738_v15 }
 0x336   :  { %v2574_v18 = vpop.f32.mrf.mxu0 }
 0x338   :  { %v667_v20 = vpop.f32.mrf.mxu0 }
 0x33a   :  { %v2575_v21 = vpop.f32.mrf.mxu0 }
 0x33b   :  { %v731_v23 = vpack.c.bf16 %v2575_v21, %v2574_v18  ;;  %v2740_v18 = vld [vmem:[%s3595_s5 + $0x48] sm:$0xff]  }
 0x33c   :  { %v670_v24 = vpop.f32.mrf.mxu0 }
 0x33d   :  { %v730_v25 = vpack.c.bf16 %v670_v24, %v667_v20  ;;  %v748_v27 = vadd.bf16 %v746_v22, %v731_v23 }
 0x33e   :  { %v2578_v36 = vpop.f32.mrf.mxu0 }
 0x33f   :  { %v747_v34 = vadd.bf16 %v746_v22, %v730_v25  ;;  %v756_v33 = vmax.bf16 %v2814_v28, %v748_v27  ;;  %v2306_v27 = vld [vmem:[%s3598_s6 + $0x1] ss:$0 sm:$0xff] }
 0x340   :  { %v683_v38 = vpop.f32.mrf.mxu0 }
 0x341   :  { %v755_v32 = vmax.bf16 %v2814_v28, %v747_v34 }
 0x342   :  { %v2579_v37 = vpop.f32.mrf.mxu0 }
 0x343   :  { %v733_v35 = vpack.c.bf16 %v2579_v37, %v2578_v36  ;;  %2596 = vmatprep.mubr.msk.bf16.mxu1 %vm423_vm2, %v755_v32 }
 0x344   :  { %v686_v39 = vpop.f32.mrf.mxu0  ;;  %2597 = vmatmul.mubr.msk.bf16.vlgmr.msra.gmra.mxu1 %vm423_vm2, %v756_v33 }
 0x345   :  { %v732_v40 = vpack.c.bf16 %v686_v39, %v683_v38  ;;  %v750_v42 = vadd.bf16 %v746_v22, %v733_v35  ;;  %2633 = vmatpush3.bf16.msra.mxu1 %v2738_v15 }
 0x346   :  { %v2582_v46 = vpop.f32.mrf.mxu0  ;;  %2634 = vmatprep.subr.bf16.mxu1 %v2739_v16 }
 0x347   :  { %v749_v47 = vadd.bf16 %v746_v22, %v732_v40  ;;  %v758_v51 = vmax.bf16 %v2814_v28, %v750_v42 }
 0x348   :  { %v699_v44 = vpop.f32.mrf.mxu0 }
 0x349   :  { %v757_v49 = vmax.bf16 %v2814_v28, %v749_v47  ;;  %2635 = vmatpush3.bf16.msra.mxu1 %v2739_v16 }
 0x34a   :  { %v2583_v50 = vpop.f32.mrf.mxu0  ;;  %2636 = vmatprep.subr.bf16.mxu1 %v2740_v18 }
 0x34b   :  { %v735_v52 = vpack.c.bf16 %v2583_v50, %v2582_v46  ;;  %2600 = vmatprep.mubr.msk.bf16.mxu1 %vm423_vm2, %v757_v49 }
 0x34c   :  { %v702_v53 = vpop.f32.mrf.mxu0  ;;  %2601 = vmatmul.mubr.msk.bf16.gmra.mxu1 %vm423_vm2, %v758_v51 }
 0x34d   :  { %v734_v54 = vpack.c.bf16 %v702_v53, %v699_v44  ;;  %v752_v59 = vadd.bf16 %v746_v22, %v735_v52  ;;  %2637 = vmatpush3.bf16.msra.mxu1 %v2740_v18  ;;  %v2743_v18 = vld [vmem:[%s3594_s3 + $0x30] sm:$0xff]  }
 0x34e   :  { %v2586_v57 = vpop.f32.mrf.mxu0 }
 0x34f   :  { %v751_v58 = vadd.bf16 %v746_v22, %v734_v54  ;;  %v760_v2 = vmax.bf16 %v2814_v28, %v752_v59 }
 0x350   :  { %v715_v55 = vpop.f32.mrf.mxu0 }
 0x351   :  { %v759_v0 = vmax.bf16 %v2814_v28, %v751_v58 }
 0x352   :  { %v2587_v60 = vpop.f32.mrf.mxu0 }
 0x353   :  { %v737_v5 = vpack.c.bf16 %v2587_v60, %v2586_v57  ;;  %2604 = vmatprep.mubr.msk.bf16.mxu1 %vm423_vm2, %v759_v0 }
 0x354   :  { %v718_v7 = vpop.f32.mrf.mxu0  ;;  %2605 = vmatmul.mubr.msk.bf16.gmra.mxu1 %vm423_vm2, %v760_v2 }
 0x355   :  { %v736_v8 = vpack.c.bf16 %v718_v7, %v715_v55  ;;  %v754_v3 = vadd.bf16 %v746_v22, %v737_v5 }
 0x357   :  { %v753_v4 = vadd.bf16 %v746_v22, %v736_v8  ;;  %v762_v6 = vmax.bf16 %v2814_v28, %v754_v3 }
 0x359   :  { %v761_v1 = vmax.bf16 %v2814_v28, %v753_v4 }
 0x35b   :  { %2608 = vmatprep.mubr.msk.bf16.mxu1 %vm423_vm2, %v761_v1 }
 0x35c   :  { %2609 = vmatmul.mubr.msk.bf16.gmra.mxu1 %vm423_vm2, %v762_v6 }
 0x404   :  { %v2598_v19 = vpop.f32.mrf.mxu1 }
 0x405   :  { %v919_v24 = vadd.f32 %v2598_v19, %v3066_v31  ;;  %v2321_v19 = vld [vmem:[%s3597_s4 + $0x2] sm:$0x1] }
 0x406   :  { %v854_v20 = vpop.f32.mrf.mxu1 }
 0x407   :  { %v917_v22 = vadd.f32 %v854_v20, %v3062_v29  ;;  %v3179_v37 = vadd.f32 %v2306_v27, %v919_v24 }
 0x408   :  { %v2599_v21 = vpop.f32.mrf.mxu1 }
 0x409   :  { %v920_v23 = vadd.f32 %v2599_v21, %v3060_v26  ;;  %v3175_v32 = vadd.f32 %v2306_v27, %v917_v22  ;;  %v1114_v21 = vpack.i.b16 %v2321_v19, %v2321_v19  ;;  %v2745_v19 = vld [vmem:[%s3595_s5 + $0x70] sm:$0xff]  }
 0x40a   :  { %v857_v25 = vpop.f32.mrf.mxu1 }
 0x40b   :  { %v918_v36 = vadd.f32 %v857_v25, %v3064_v30  ;;  %v3173_v34 = vadd.f32 %v2306_v27, %v920_v23  ;;  %v1119_v24 = vrot.slane %v1114_v21, %v3025_v17 }
 0x40c   :  { %v2602_v38 = vpop.f32.mrf.mxu1 }
 0x40d   :  { %v3177_v33 = vadd.f32 %v2306_v27, %v918_v36  ;;  %v958_v31 = vpack.c.bf16 %v3173_v34, %v3179_v37  ;;  %v923_v40 = vadd.f32 %v2602_v38, %v3084_v48 }
 0x40e   :  { %v870_v29 = vpop.f32.mrf.mxu1 }
 0x40f   :  { %v957_v26 = vpack.c.bf16 %v3177_v33, %v3175_v32  ;;  %v921_v39 = vadd.f32 %v870_v29, %v3080_v43  ;;  %v3197_v50 = vadd.f32 %v2306_v27, %v923_v40 }
 0x410   :  { %v2603_v35 = vpop.f32.mrf.mxu1 }
 0x411   :  { %v924_v30 = vadd.f32 %v2603_v35, %v3078_v41  ;;  %2616 = vmatprep.mubr.msk.bf16.mxu0 %vm237_vm1, %v957_v26  ;;  %v3193_v49 = vadd.f32 %v2306_v27, %v921_v39 }
 0x412   :  { %v873_v42 = vpop.f32.mrf.mxu1  ;;  %2617 = vmatmul.mubr.msk.bf16.vlgmr.msra.gmra.mxu0 %vm237_vm1, %v958_v31 }
 0x413   :  { %v922_v46 = vadd.f32 %v873_v42, %v3082_v45  ;;  %v3191_v47 = vadd.f32 %v2306_v27, %v924_v30 }
 0x414   :  { %v2606_v44 = vpop.f32.mrf.mxu1 }
 0x415   :  { %v3195_v51 = vadd.f32 %v2306_v27, %v922_v46  ;;  %v960_v48 = vpack.c.bf16 %v3191_v47, %v3197_v50  ;;  %v927_v54 = vadd.f32 %v2606_v44, %v3102_v63 }
 0x416   :  { %v886_v43 = vpop.f32.mrf.mxu1 }
 0x417   :  { %v959_v41 = vpack.c.bf16 %v3195_v51, %v3193_v49  ;;  %v925_v53 = vadd.f32 %v886_v43, %v3098_v61  ;;  %v3215_v60 = vadd.f32 %v2306_v27, %v927_v54 }
 0x418   :  { %v2607_v52 = vpop.f32.mrf.mxu1 }
 0x419   :  { %v928_v45 = vadd.f32 %v2607_v52, %v3096_v56  ;;  %2620 = vmatprep.mubr.msk.bf16.mxu0 %vm237_vm1, %v959_v41  ;;  %v3211_v0 = vadd.f32 %v2306_v27, %v925_v53 }
 0x41a   :  { %v889_v59 = vpop.f32.mrf.mxu1  ;;  %2621 = vmatmul.mubr.msk.bf16.gmra.mxu0 %vm237_vm1, %v960_v48 }
 0x41b   :  { %v926_v57 = vadd.f32 %v889_v59, %v3100_v62  ;;  %v3209_v58 = vadd.f32 %v2306_v27, %v928_v45 }
 0x41c   :  { %v2610_v55 = vpop.f32.mrf.mxu1 }
 0x41d   :  { %v3213_v2 = vadd.f32 %v2306_v27, %v926_v57  ;;  %v962_v63 = vpack.c.bf16 %v3209_v58, %v3215_v60  ;;  %v931_v8 = vadd.f32 %v2610_v55, %v3120_v14  ;;  %v2742_v14 = vld [vmem:[%s3594_s3 + $0x38] sm:$0xff]  }
 0x41e   :  { %v902_v61 = vpop.f32.mrf.mxu1  ;;  %2656 = vmatprep.subr.bf16.mxu0 %v2742_v14 }
 0x41f   :  { %v961_v56 = vpack.c.bf16 %v3213_v2, %v3211_v0  ;;  %v929_v7 = vadd.f32 %v902_v61, %v3116_v10  ;;  %v3233_v16 = vadd.f32 %v2306_v27, %v931_v8  ;;  %2657 = vmatpush3.bf16.msra.mxu0 %v2742_v14 }
 0x420   :  { %v2611_v5 = vpop.f32.mrf.mxu1  ;;  %2658 = vmatprep.subr.bf16.mxu0 %v2743_v18 }
 0x421   :  { %v932_v62 = vadd.f32 %v2611_v5, %v3114_v9  ;;  %2624 = vmatprep.mubr.msk.bf16.mxu0 %vm237_vm1, %v961_v56  ;;  %v3229_v6 = vadd.f32 %v2306_v27, %v929_v7 }
 0x422   :  { %v905_v3 = vpop.f32.mrf.mxu1  ;;  %2625 = vmatmul.mubr.msk.bf16.gmra.mxu0 %vm237_vm1, %v962_v63 }
 0x423   :  { %v930_v4 = vadd.f32 %v905_v3, %v3118_v11  ;;  %v3227_v1 = vadd.f32 %v2306_v27, %v932_v62  ;;  %v2741_v11 = vld [vmem:[%s3595_s5 + $0x40] sm:$0xff]   ;;  %2659 = vmatpush3.bf16.msra.mxu0 %v2743_v18  ;;  %v2744_v18 = vld [vmem:[%s3595_s5 + $0x78] sm:$0xff]  }
 0x424   :  { %2638 = vmatprep.subr.bf16.mxu1 %v2741_v11 }
 0x425   :  { %v3231_v15 = vadd.f32 %v2306_v27, %v930_v4  ;;  %v964_v10 = vpack.c.bf16 %v3227_v1, %v3233_v16  ;;  %2639 = vmatpush3.bf16.msra.mxu1 %v2741_v11 }
 0x426   :  { %2676 = vmatprep.subr.bf16.mxu1 %v2744_v18 }
 0x427   :  { %v963_v9 = vpack.c.bf16 %v3231_v15, %v3229_v6 }
 0x429   :  { %2628 = vmatprep.mubr.msk.bf16.mxu0 %vm237_vm1, %v963_v9 }
 0x42a   :  { %2629 = vmatmul.mubr.msk.bf16.gmra.mxu0 %vm237_vm1, %v964_v10 }
 0x4d2   :  { %v2618_v20 = vpop.f32.mrf.mxu0 }
 0x4d4   :  { %v1040_v22 = vpop.f32.mrf.mxu0 }
 0x4d6   :  { %v2619_v23 = vpop.f32.mrf.mxu0 }
 0x4d7   :  { %v1104_v25 = vpack.c.bf16 %v2619_v23, %v2618_v20  ;;  %v2746_v20 = vld [vmem:[%s3595_s5 + $0x68] sm:$0xff]  }
 0x4d8   :  { %v1043_v27 = vpop.f32.mrf.mxu0 }
 0x4d9   :  { %v1103_v36 = vpack.c.bf16 %v1043_v27, %v1040_v22  ;;  %v1121_v38 = vadd.bf16 %v1119_v24, %v1104_v25 }
 0x4da   :  { %v2622_v29 = vpop.f32.mrf.mxu0 }
 0x4db   :  { %v1120_v26 = vadd.bf16 %v1119_v24, %v1103_v36  ;;  %v1129_v39 = vmax.bf16 %v2814_v28, %v1121_v38  ;;  %v2343_v38 = vld [vmem:[%s3598_s6 + $0x2] ss:$0 sm:$0xff] }
 0x4dc   :  { %v1056_v31 = vpop.f32.mrf.mxu0 }
 0x4dd   :  { %v1128_v35 = vmax.bf16 %v2814_v28, %v1120_v26 }
 0x4de   :  { %v2623_v30 = vpop.f32.mrf.mxu0 }
 0x4df   :  { %v1106_v40 = vpack.c.bf16 %v2623_v30, %v2622_v29  ;;  %2640 = vmatprep.mubr.msk.bf16.mxu1 %vm423_vm2, %v1128_v35 }
 0x4e0   :  { %v1059_v42 = vpop.f32.mrf.mxu0  ;;  %2641 = vmatmul.mubr.msk.bf16.vlgmr.msra.gmra.mxu1 %vm423_vm2, %v1129_v39 }
 0x4e1   :  { %v1105_v46 = vpack.c.bf16 %v1059_v42, %v1056_v31  ;;  %v1123_v44 = vadd.bf16 %v1119_v24, %v1106_v40  ;;  %2677 = vmatpush3.bf16.msra.mxu1 %v2744_v18 }
 0x4e2   :  { %v2626_v43 = vpop.f32.mrf.mxu0  ;;  %2678 = vmatprep.subr.bf16.mxu1 %v2745_v19 }
 0x4e3   :  { %v1122_v41 = vadd.bf16 %v1119_v24, %v1105_v46  ;;  %v1131_v53 = vmax.bf16 %v2814_v28, %v1123_v44 }
 0x4e4   :  { %v1072_v48 = vpop.f32.mrf.mxu0 }
 0x4e5   :  { %v1130_v52 = vmax.bf16 %v2814_v28, %v1122_v41  ;;  %2679 = vmatpush3.bf16.msra.mxu1 %v2745_v19 }
 0x4e6   :  { %v2627_v45 = vpop.f32.mrf.mxu0  ;;  %2680 = vmatprep.subr.bf16.mxu1 %v2746_v20 }
 0x4e7   :  { %v1108_v54 = vpack.c.bf16 %v2627_v45, %v2626_v43  ;;  %2644 = vmatprep.mubr.msk.bf16.mxu1 %vm423_vm2, %v1130_v52 }
 0x4e8   :  { %v1075_v59 = vpop.f32.mrf.mxu0  ;;  %2645 = vmatmul.mubr.msk.bf16.gmra.mxu1 %vm423_vm2, %v1131_v53 }
 0x4e9   :  { %v1107_v57 = vpack.c.bf16 %v1075_v59, %v1072_v48  ;;  %v1125_v55 = vadd.bf16 %v1119_v24, %v1108_v54  ;;  %2681 = vmatpush3.bf16.msra.mxu1 %v2746_v20  ;;  %v2749_v20 = vld [vmem:[%s3599_s7] sm:$0xff]  }
 0x4ea   :  { %v2630_v61 = vpop.f32.mrf.mxu0 }
 0x4eb   :  { %v1124_v56 = vadd.bf16 %v1119_v24, %v1107_v57  ;;  %v1133_v7 = vmax.bf16 %v2814_v28, %v1125_v55 }
 0x4ec   :  { %v1088_v63 = vpop.f32.mrf.mxu0 }
 0x4ed   :  { %v1132_v5 = vmax.bf16 %v2814_v28, %v1124_v56 }
 0x4ee   :  { %v2631_v62 = vpop.f32.mrf.mxu0 }
 0x4ef   :  { %v1110_v8 = vpack.c.bf16 %v2631_v62, %v2630_v61  ;;  %2648 = vmatprep.mubr.msk.bf16.mxu1 %vm423_vm2, %v1132_v5 }
 0x4f0   :  { %v1091_v3 = vpop.f32.mrf.mxu0  ;;  %2649 = vmatmul.mubr.msk.bf16.gmra.mxu1 %vm423_vm2, %v1133_v7 }
 0x4f1   :  { %v1109_v4 = vpack.c.bf16 %v1091_v3, %v1088_v63  ;;  %v1127_v9 = vadd.bf16 %v1119_v24, %v1110_v8 }
 0x4f3   :  { %v1126_v10 = vadd.bf16 %v1119_v24, %v1109_v4  ;;  %v1135_v14 = vmax.bf16 %v2814_v28, %v1127_v9 }
 0x4f5   :  { %v1134_v11 = vmax.bf16 %v2814_v28, %v1126_v10 }
 0x4f7   :  { %2652 = vmatprep.mubr.msk.bf16.mxu1 %vm423_vm2, %v1134_v11 }
 0x4f8   :  { %2653 = vmatmul.mubr.msk.bf16.gmra.mxu1 %vm423_vm2, %v1135_v14 }
 0x5a0   :  { %v2642_v21 = vpop.f32.mrf.mxu1 }
 0x5a1   :  { %v1292_v27 = vadd.f32 %v2642_v21, %v3179_v37  ;;  %v2358_v21 = vld [vmem:[%s3597_s4 + $0x3] sm:$0x1] }
 0x5a2   :  { %v1227_v22 = vpop.f32.mrf.mxu1 }
 0x5a3   :  { %v1290_v24 = vadd.f32 %v1227_v22, %v3175_v32  ;;  %v3292_v30 = vadd.f32 %v2343_v38, %v1292_v27 }
 0x5a4   :  { %v2643_v23 = vpop.f32.mrf.mxu1 }
 0x5a5   :  { %v1293_v25 = vadd.f32 %v2643_v23, %v3173_v34  ;;  %v3288_v35 = vadd.f32 %v2343_v38, %v1290_v24  ;;  %v1487_v23 = vpack.i.b16 %v2358_v21, %v2358_v21 }
 0x5a6   :  { %v1230_v36 = vpop.f32.mrf.mxu1 }
 0x5a7   :  { %v1291_v29 = vadd.f32 %v1230_v36, %v3177_v33  ;;  %v3286_v26 = vadd.f32 %v2343_v38, %v1293_v25  ;;  %v1492_v27 = vrot.slane %v1487_v23, %v3025_v17 }
 0x5a8   :  { %v2646_v31 = vpop.f32.mrf.mxu1 }
 0x5a9   :  { %v3290_v39 = vadd.f32 %v2343_v38, %v1291_v29  ;;  %v1331_v37 = vpack.c.bf16 %v3286_v26, %v3292_v30  ;;  %v1296_v46 = vadd.f32 %v2646_v31, %v3197_v50 }
 0x5aa   :  { %v1243_v32 = vpop.f32.mrf.mxu1 }
 0x5ab   :  { %v1330_v34 = vpack.c.bf16 %v3290_v39, %v3288_v35  ;;  %v1294_v42 = vadd.f32 %v1243_v32, %v3193_v49  ;;  %v3310_v45 = vadd.f32 %v2343_v38, %v1296_v46 }
 0x5ac   :  { %v2647_v40 = vpop.f32.mrf.mxu1 }
 0x5ad   :  { %v1297_v33 = vadd.f32 %v2647_v40, %v3191_v47  ;;  %2660 = vmatprep.mubr.msk.bf16.mxu0 %vm237_vm1, %v1330_v34  ;;  %v3306_v52 = vadd.f32 %v2343_v38, %v1294_v42 }
 0x5ae   :  { %v1246_v44 = vpop.f32.mrf.mxu1  ;;  %2661 = vmatmul.mubr.msk.bf16.vlgmr.msra.gmra.mxu0 %vm237_vm1, %v1331_v37 }
 0x5af   :  { %v1295_v43 = vadd.f32 %v1246_v44, %v3195_v51  ;;  %v3304_v41 = vadd.f32 %v2343_v38, %v1297_v33 }
 0x5b0   :  { %v2650_v48 = vpop.f32.mrf.mxu1 }
 0x5b1   :  { %v3308_v53 = vadd.f32 %v2343_v38, %v1295_v43  ;;  %v1333_v50 = vpack.c.bf16 %v3304_v41, %v3310_v45  ;;  %v1300_v57 = vadd.f32 %v2650_v48, %v3215_v60 }
 0x5b2   :  { %v1259_v49 = vpop.f32.mrf.mxu1 }
 0x5b3   :  { %v1332_v47 = vpack.c.bf16 %v3308_v53, %v3306_v52  ;;  %v1298_v59 = vadd.f32 %v1259_v49, %v3211_v0  ;;  %v3328_v62 = vadd.f32 %v2343_v38, %v1300_v57 }
 0x5b4   :  { %v2651_v54 = vpop.f32.mrf.mxu1 }
 0x5b5   :  { %v1301_v51 = vadd.f32 %v2651_v54, %v3209_v58  ;;  %2664 = vmatprep.mubr.msk.bf16.mxu0 %vm237_vm1, %v1332_v47  ;;  %v3324_v5 = vadd.f32 %v2343_v38, %v1298_v59 }
 0x5b6   :  { %v1262_v55 = vpop.f32.mrf.mxu1  ;;  %2665 = vmatmul.mubr.msk.bf16.gmra.mxu0 %vm237_vm1, %v1333_v50 }
 0x5b7   :  { %v1299_v61 = vadd.f32 %v1262_v55, %v3213_v2  ;;  %v3322_v56 = vadd.f32 %v2343_v38, %v1301_v51 }
 0x5b8   :  { %v2654_v63 = vpop.f32.mrf.mxu1 }
 0x5b9   :  { %v3326_v7 = vadd.f32 %v2343_v38, %v1299_v61  ;;  %v1335_v60 = vpack.c.bf16 %v3322_v56, %v3328_v62  ;;  %v1304_v4 = vadd.f32 %v2654_v63, %v3233_v16  ;;  %v2748_v16 = vld [vmem:[%s3599_s7 + $0x8] sm:$0xff]  }
 0x5ba   :  { %v1275_v0 = vpop.f32.mrf.mxu1  ;;  %2700 = vmatprep.subr.bf16.mxu0 %v2748_v16 }
 0x5bb   :  { %v1334_v58 = vpack.c.bf16 %v3326_v7, %v3324_v5  ;;  %v1302_v3 = vadd.f32 %v1275_v0, %v3229_v6  ;;  %v3346_v19 = vadd.f32 %v2343_v38, %v1304_v4  ;;  %2701 = vmatpush3.bf16.msra.mxu0 %v2748_v16 }
 0x5bc   :  { %v2655_v8 = vpop.f32.mrf.mxu1  ;;  %2702 = vmatprep.subr.bf16.mxu0 %v2749_v20 }
 0x5bd   :  { %v1305_v2 = vadd.f32 %v2655_v8, %v3227_v1  ;;  %2668 = vmatprep.mubr.msk.bf16.mxu0 %vm237_vm1, %v1334_v58  ;;  %v3342_v14 = vadd.f32 %v2343_v38, %v1302_v3 }
 0x5be   :  { %v1278_v9 = vpop.f32.mrf.mxu1  ;;  %2669 = vmatmul.mubr.msk.bf16.gmra.mxu0 %vm237_vm1, %v1335_v60 }
 0x5bf   :  { %v1303_v10 = vadd.f32 %v1278_v9, %v3231_v15  ;;  %v3340_v11 = vadd.f32 %v2343_v38, %v1305_v2  ;;  %v2747_v15 = vld [vmem:[%s3595_s5 + $0x60] sm:$0xff]   ;;  %2703 = vmatpush3.bf16.msra.mxu0 %v2749_v20 }
 0x5c0   :  { %2682 = vmatprep.subr.bf16.mxu1 %v2747_v15 }
 0x5c1   :  { %v3344_v18 = vadd.f32 %v2343_v38, %v1303_v10  ;;  %v1337_v6 = vpack.c.bf16 %v3340_v11, %v3346_v19  ;;  %2683 = vmatpush3.bf16.msra.mxu1 %v2747_v15 }
 0x5c3   :  { %v1336_v1 = vpack.c.bf16 %v3344_v18, %v3342_v14 }
 0x5c5   :  { %2672 = vmatprep.mubr.msk.bf16.mxu0 %vm237_vm1, %v1336_v1 }
 0x5c6   :  { %2673 = vmatmul.mubr.msk.bf16.gmra.mxu0 %vm237_vm1, %v1337_v6 }
 0x66e   :  { %v2662_v22 = vpop.f32.mrf.mxu0 }
 0x670   :  { %v1413_v24 = vpop.f32.mrf.mxu0 }
 0x672   :  { %v2663_v25 = vpop.f32.mrf.mxu0 }
 0x673   :  { %v1477_v36 = vpack.c.bf16 %v2663_v25, %v2662_v22 }
 0x674   :  { %v1416_v38 = vpop.f32.mrf.mxu0 }
 0x675   :  { %v1476_v29 = vpack.c.bf16 %v1416_v38, %v1413_v24  ;;  %v1494_v31 = vadd.bf16 %v1492_v27, %v1477_v36 }
 0x676   :  { %v2666_v32 = vpop.f32.mrf.mxu0 }
 0x677   :  { %v1493_v34 = vadd.bf16 %v1492_v27, %v1476_v29  ;;  %v1502_v42 = vmax.bf16 %v2814_v28, %v1494_v31 }
 0x678   :  { %v1429_v37 = vpop.f32.mrf.mxu0 }
 0x679   :  { %v1501_v40 = vmax.bf16 %v2814_v28, %v1493_v34 }
 0x67a   :  { %v2667_v33 = vpop.f32.mrf.mxu0 }
 0x67b   :  { %v1479_v46 = vpack.c.bf16 %v2667_v33, %v2666_v32  ;;  %2684 = vmatprep.mubr.msk.bf16.mxu1 %vm423_vm2, %v1501_v40 }
 0x67c   :  { %v1432_v44 = vpop.f32.mrf.mxu0  ;;  %2685 = vmatmul.mubr.msk.bf16.vlgmr.msra.gmra.mxu1 %vm423_vm2, %v1502_v42 }
 0x67d   :  { %v1478_v43 = vpack.c.bf16 %v1432_v44, %v1429_v37  ;;  %v1496_v17 = vadd.bf16 %v1492_v27, %v1479_v46 }
 0x67e   :  { %v2670_v48 = vpop.f32.mrf.mxu0 }
 0x67f   :  { %v1495_v49 = vadd.bf16 %v1492_v27, %v1478_v43  ;;  %v1504_v54 = vmax.bf16 %v2814_v28, %v1496_v17 }
 0x680   :  { %v1445_v47 = vpop.f32.mrf.mxu0 }
 0x681   :  { %v1503_v50 = vmax.bf16 %v2814_v28, %v1495_v49 }
 0x682   :  { %v2671_v59 = vpop.f32.mrf.mxu0 }
 0x683   :  { %v1481_v51 = vpack.c.bf16 %v2671_v59, %v2670_v48  ;;  %2688 = vmatprep.mubr.msk.bf16.mxu1 %vm423_vm2, %v1503_v50 }
 0x684   :  { %v1448_v57 = vpop.f32.mrf.mxu0  ;;  %2689 = vmatmul.mubr.msk.bf16.gmra.mxu1 %vm423_vm2, %v1504_v54 }
 0x685   :  { %v1480_v55 = vpack.c.bf16 %v1448_v57, %v1445_v47  ;;  %v1498_v61 = vadd.bf16 %v1492_v27, %v1481_v51 }
 0x686   :  { %v2674_v63 = vpop.f32.mrf.mxu0 }
 0x687   :  { %v1497_v0 = vadd.bf16 %v1492_v27, %v1480_v55  ;;  %v1506_v8 = vmax.bf16 %v2814_v28, %v1498_v61 }
 0x688   :  { %v1461_v58 = vpop.f32.mrf.mxu0 }
 0x689   :  { %v1505_v60 = vmax.bf16 %v2814_v28, %v1497_v0 }
 0x68a   :  { %v2675_v3 = vpop.f32.mrf.mxu0 }
 0x68b   :  { %v1483_v2 = vpack.c.bf16 %v2675_v3, %v2674_v63  ;;  %2692 = vmatprep.mubr.msk.bf16.mxu1 %vm423_vm2, %v1505_v60 }
 0x68c   :  { %v1464_v4 = vpop.f32.mrf.mxu0  ;;  %2693 = vmatmul.mubr.msk.bf16.gmra.mxu1 %vm423_vm2, %v1506_v8 }
 0x68d   :  { %v1482_v9 = vpack.c.bf16 %v1464_v4, %v1461_v58  ;;  %v1500_v10 = vadd.bf16 %v1492_v27, %v1483_v2 }
 0x68f   :  { %v1499_v1 = vadd.bf16 %v1492_v27, %v1482_v9  ;;  %v1508_v15 = vmax.bf16 %v2814_v28, %v1500_v10  ;;  %v2380_v27 = vld [vmem:[%s3598_s6 + $0x3] ss:$0 sm:$0xff] }
 0x691   :  { %v1507_v6 = vmax.bf16 %v2814_v28, %v1499_v1 }
 0x693   :  { %2696 = vmatprep.mubr.msk.bf16.mxu1 %vm423_vm2, %v1507_v6 }
 0x694   :  { %2697 = vmatmul.mubr.msk.bf16.gmra.mxu1 %vm423_vm2, %v1508_v15 }
 0x73c   :  { %v2686_v16 = vpop.f32.mrf.mxu1 }
 0x73d   :  { %v1665_v24 = vadd.f32 %v2686_v16, %v3292_v30 }
 0x73e   :  { %v1600_v20 = vpop.f32.mrf.mxu1 }
 0x73f   :  { %v1663_v22 = vadd.f32 %v1600_v20, %v3288_v35  ;;  %v1689_v32 = vadd.f32 %v2380_v27, %v1665_v24 }
 0x740   :  { %v2687_v21 = vpop.f32.mrf.mxu1 }
 0x741   :  { %v1666_v23 = vadd.f32 %v2687_v21, %v3286_v26  ;;  %v1687_v29 = vadd.f32 %v2380_v27, %v1663_v22 }
 0x742   :  { %v1603_v25 = vpop.f32.mrf.mxu1 }
 0x743   :  { %v1664_v28 = vadd.f32 %v1603_v25, %v3290_v39  ;;  %v1690_v36 = vadd.f32 %v2380_v27, %v1666_v23 }
 0x744   :  { %v2690_v38 = vpop.f32.mrf.mxu1 }
 0x745   :  { %v1688_v31 = vadd.f32 %v2380_v27, %v1664_v28  ;;  %v1704_v40 = vpack.c.bf16 %v1690_v36, %v1689_v32  ;;  %v1669_v42 = vadd.f32 %v2690_v38, %v3310_v45 }
 0x746   :  { %v1616_v34 = vpop.f32.mrf.mxu1 }
 0x747   :  { %v1703_v37 = vpack.c.bf16 %v1688_v31, %v1687_v29  ;;  %v1667_v26 = vadd.f32 %v1616_v34, %v3306_v52  ;;  %v1693_v48 = vadd.f32 %v2380_v27, %v1669_v42 }
 0x748   :  { %v2691_v35 = vpop.f32.mrf.mxu1 }
 0x749   :  { %v1670_v30 = vadd.f32 %v2691_v35, %v3304_v41  ;;  %2704 = vmatprep.mubr.msk.bf16.mxu0 %vm237_vm1, %v1703_v37  ;;  %v1691_v43 = vadd.f32 %v2380_v27, %v1667_v26 }
 0x74a   :  { %v1619_v33 = vpop.f32.mrf.mxu1  ;;  %2705 = vmatmul.mubr.msk.bf16.vlgmr.msra.gmra.mxu0 %vm237_vm1, %v1704_v40 }
 0x74b   :  { %v1668_v39 = vadd.f32 %v1619_v33, %v3308_v53  ;;  %v1694_v46 = vadd.f32 %v2380_v27, %v1670_v30 }
 0x74c   :  { %v2694_v44 = vpop.f32.mrf.mxu1 }
 0x74d   :  { %v1692_v17 = vadd.f32 %v2380_v27, %v1668_v39  ;;  %v1706_v50 = vpack.c.bf16 %v1694_v46, %v1693_v48  ;;  %v1673_v45 = vadd.f32 %v2694_v44, %v3328_v62 }
 0x74e   :  { %v1632_v49 = vpop.f32.mrf.mxu1 }
 0x74f   :  { %v1705_v47 = vpack.c.bf16 %v1692_v17, %v1691_v43  ;;  %v1671_v41 = vadd.f32 %v1632_v49, %v3324_v5  ;;  %v1697_v63 = vadd.f32 %v2380_v27, %v1673_v45 }
 0x750   :  { %v2695_v52 = vpop.f32.mrf.mxu1 }
 0x751   :  { %v1674_v54 = vadd.f32 %v2695_v52, %v3322_v56  ;;  %2708 = vmatprep.mubr.msk.bf16.mxu0 %vm237_vm1, %v1705_v47  ;;  %v1695_v55 = vadd.f32 %v2380_v27, %v1671_v41 }
 0x752   :  { %v1635_v59 = vpop.f32.mrf.mxu1  ;;  %2709 = vmatmul.mubr.msk.bf16.gmra.mxu0 %vm237_vm1, %v1706_v50 }
 0x753   :  { %v1672_v53 = vadd.f32 %v1635_v59, %v3326_v7  ;;  %v1698_v51 = vadd.f32 %v2380_v27, %v1674_v54 }
 0x754   :  { %v2698_v57 = vpop.f32.mrf.mxu1 }
 0x755   :  { %v1696_v61 = vadd.f32 %v2380_v27, %v1672_v53  ;;  %v1708_v60 = vpack.c.bf16 %v1698_v51, %v1697_v63  ;;  %v1677_v62 = vadd.f32 %v2698_v57, %v3346_v19 }
 0x756   :  { %v1648_v0 = vpop.f32.mrf.mxu1 }
 0x757   :  { %v1707_v58 = vpack.c.bf16 %v1696_v61, %v1695_v55  ;;  %v1675_v56 = vadd.f32 %v1648_v0, %v3342_v14  ;;  %v1701_v10 = vadd.f32 %v2380_v27, %v1677_v62 }
 0x758   :  { %v2699_v5 = vpop.f32.mrf.mxu1 }
 0x759   :  { %v1678_v8 = vadd.f32 %v2699_v5, %v3340_v11  ;;  %2712 = vmatprep.mubr.msk.bf16.mxu0 %vm237_vm1, %v1707_v58  ;;  %v1699_v4 = vadd.f32 %v2380_v27, %v1675_v56  ;;  %v2381_v11 = vld [vmem:[%s3600_s8] ss:$0 sm:$0xff] }
 0x75a   :  { %v1651_v3 = vpop.f32.mrf.mxu1  ;;  %2713 = vmatmul.mubr.msk.bf16.gmra.mxu0 %vm237_vm1, %v1708_v60 }
 0x75b   :  { %v1676_v7 = vadd.f32 %v1651_v3, %v3344_v18  ;;  %v1702_v2 = vadd.f32 %v2380_v27, %v1678_v8 }
 0x75d   :  { %v1700_v9 = vadd.f32 %v2380_v27, %v1676_v7  ;;  %v1710_v6 = vpack.c.bf16 %v1702_v2, %v1701_v10 }
 0x75f   :  { %v1709_v1 = vpack.c.bf16 %v1700_v9, %v1699_v4 }
 0x761   :  { %2716 = vmatprep.mubr.msk.bf16.mxu0 %vm237_vm1, %v1709_v1 }
 0x762   :  { %2717 = vmatmul.mubr.msk.bf16.gmra.mxu0 %vm237_vm1, %v1710_v6 }
 0x80a   :  { %v2706_v14 = vpop.f32.mrf.mxu0 }
 0x80b   :  { %v3413_v19 = vadd.f32 %v2706_v14, %v2381_v11 }
 0x80c   :  { %v1792_v15 = vpop.f32.mrf.mxu0 }
 0x80d   :  { %v3415_v16 = vadd.f32 %v2381_v11, %v1792_v15  ;;  %v1861_v18 = vsel %vm237_vm1, %v3413_v19, -inf }
 0x80e   :  { %1862 = vmax.xlane.f32.xlu1 %v1861_v18  ;;  %v2707_v20 = vpop.f32.mrf.mxu0 }
 0x80f   :  { %v3419_v21 = vadd.f32 %v2707_v20, %v2381_v11  ;;  %v1855_v22 = vsel %vm237_vm1, %v3415_v16, -inf }
 0x810   :  { %v1795_v23 = vpop.f32.mrf.mxu0  ;;  %1856 = vmax.xlane.f32.xlu0 %v1855_v22 }
 0x811   :  { %v3423_v24 = vadd.f32 %v2381_v11, %v1795_v23  ;;  %v1864_v25 = vsel %vm237_vm1, %v3419_v21, -inf }
 0x812   :  { %1865 = vmax.xlane.f32.xlu1 %v1864_v25  ;;  %v2710_v27 = vpop.f32.mrf.mxu0 }
 0x813   :  { %v3427_v28 = vadd.f32 %v2710_v27, %v2381_v11  ;;  %v1858_v36 = vsel %vm237_vm1, %v3423_v24, -inf }
 0x814   :  { %v1808_v38 = vpop.f32.mrf.mxu0  ;;  %1859 = vmax.xlane.f32.xlu0 %v1858_v36 }
 0x815   :  { %v3431_v31 = vadd.f32 %v2381_v11, %v1808_v38  ;;  %v1873_v34 = vsel %vm237_vm1, %v3427_v28, -inf  ;;  %v3489_v38 = vld [vmem:[%s3601_s9] ss:$0 sm:$0xff] }
 0x816   :  { %v2711_v29 = vpop.f32.mrf.mxu0 }
 0x817   :  { %v3433_v32 = vadd.f32 %v2711_v29, %v2381_v11  ;;  %v1867_v42 = vsel %vm237_vm1, %v3431_v31, -inf }
 0x818   :  { %v1811_v37 = vpop.f32.mrf.mxu0  ;;  %1874 = vmax.xlane.f32.xlu0 %v1873_v34 }
 0x819   :  { %v3437_v40 = vadd.f32 %v2381_v11, %v1811_v37  ;;  %v1876_v35 = vsel %vm237_vm1, %v3433_v32, -inf }
 0x81a   :  { %1877 = vmax.xlane.f32.xlu1 %v1876_v35  ;;  %v2714_v26 = vpop.f32.mrf.mxu0 }
 0x81b   :  { %v3441_v30 = vadd.f32 %v2714_v26, %v2381_v11  ;;  %v1870_v39 = vsel %vm237_vm1, %v3437_v40, -inf }
 0x81c   :  { %v1824_v33 = vpop.f32.mrf.mxu0  ;;  %1868 = vmax.xlane.f32.xlu0 %v1867_v42 }
 0x81d   :  { %v3447_v44 = vadd.f32 %v2381_v11, %v1824_v33  ;;  %v1885_v17 = vsel %vm237_vm1, %v3441_v30, -inf }
 0x81e   :  { %v2715_v46 = vpop.f32.mrf.mxu0  ;;  %1871 = vmax.xlane.f32.xlu1 %v1870_v39 }
 0x81f   :  { %v3449_v43 = vadd.f32 %v2715_v46, %v2381_v11  ;;  %v1879_v52 = vsel %vm237_vm1, %v3447_v44, -inf }
 0x820   :  { %v1827_v48 = vpop.f32.mrf.mxu0  ;;  %1886 = vmax.xlane.f32.xlu0 %v1885_v17 }
 0x821   :  { %v3453_v49 = vadd.f32 %v2381_v11, %v1827_v48  ;;  %v1888_v47 = vsel %vm237_vm1, %v3449_v43, -inf }
 0x822   :  { %1889 = vmax.xlane.f32.xlu1 %v1888_v47  ;;  %v2718_v50 = vpop.f32.mrf.mxu0 }
 0x823   :  { %v1882_v45 = vsel %vm237_vm1, %v3453_v49, -inf  ;;  %v3463_v53 = vadd.f32 %v2718_v50, %v2381_v11 }
 0x824   :  { %1880 = vmax.xlane.f32.xlu0 %v1879_v52  ;;  %v1840_v41 = vpop.f32.mrf.mxu0 }
 0x825   :  { %v3459_v54 = vadd.f32 %v2381_v11, %v1840_v41  ;;  %v1897_v0 = vsel %vm237_vm1, %v3463_v53, -inf }
 0x826   :  { %1883 = vmax.xlane.f32.xlu1 %v1882_v45  ;;  %v2719_v59 = vpop.f32.mrf.mxu0 }
 0x827   :  { %v1891_v51 = vsel %vm237_vm1, %v3459_v54, -inf  ;;  %v3469_v61 = vadd.f32 %v2719_v59, %v2381_v11 }
 0x828   :  { %v1843_v57 = vpop.f32.mrf.mxu0  ;;  %1892 = vmax.xlane.f32.xlu0 %v1891_v51 }
 0x829   :  { %v3467_v55 = vadd.f32 %v2381_v11, %v1843_v57  ;;  %v1900_v58 = vsel %vm237_vm1, %v3469_v61, -inf }
 0x82b   :  { %v1894_v63 = vsel %vm237_vm1, %v3467_v55, -inf }
 0x82c   :  { %1895 = vmax.xlane.f32.xlu1 %v1894_v63  ;;  %1898 = vmax.xlane.f32.xlu0 %v1897_v0 }
 0x830   :  { %1901 = vmax.xlane.f32.xlu1 %v1900_v58 }
 0x897   :  { %v1863_v60 = vpop.xlane.xlu1 %1862 }
 0x898   :  { %v1905_v5 = vsub.f32 %v3413_v19, %v1863_v60 }
 0x899   :  { %v1857_v56 = vpop.xlane.xlu0 %1856 }
 0x89a   :  { %v1923_v8 = vmul.f32 1.442695, %v1905_v5  ;;  %v1903_v62 = vsub.f32 %v3415_v16, %v1857_v56 }
 0x89b   :  { %v1866_v3 = vpop.xlane.xlu1 %1865 }
 0x89c   :  { %2750 = vpow2.f32 %v1923_v8  ;;  %v1919_v7 = vmul.f32 1.442695, %v1903_v62  ;;  %v1906_v2 = vsub.f32 %v3419_v21, %v1866_v3 }
 0x89d   :  { %v1860_v4 = vpop.xlane.xlu0 %1859 }
 0x89e   :  { %2752 = vpow2.f32 %v1919_v7  ;;  %v1925_v9 = vmul.f32 1.442695, %v1906_v2  ;;  %v1904_v10 = vsub.f32 %v3423_v24, %v1860_v4 }
 0x8a0   :  { %2754 = vpow2.f32 %v1925_v9  ;;  %v1921_v1 = vmul.f32 1.442695, %v1904_v10 }
 0x8a1   :  { %v1875_v6 = vpop.xlane.xlu0 %1874 }
 0x8a2   :  { %v1909_v11 = vsub.f32 %v3427_v28, %v1875_v6  ;;  %2756 = vpow2.f32 %v1921_v1 }
 0x8a3   :  { %v1878_v14 = vpop.xlane.xlu1 %1877 }
 0x8a4   :  { %v1931_v19 = vmul.f32 1.442695, %v1909_v11  ;;  %v1910_v15 = vsub.f32 %v3433_v32, %v1878_v14 }
 0x8a5   :  { %v1869_v16 = vpop.xlane.xlu0 %1868 }
 0x8a6   :  { %2758 = vpow2.f32 %v1931_v19  ;;  %v1907_v18 = vsub.f32 %v3431_v31, %v1869_v16  ;;  %v1933_v21 = vmul.f32 1.442695, %v1910_v15 }
 0x8a7   :  { %v1872_v20 = vpop.xlane.xlu1 %1871 }
 0x8a8   :  { %v1927_v23 = vmul.f32 1.442695, %v1907_v18  ;;  %v1908_v24 = vsub.f32 %v3437_v40, %v1872_v20  ;;  %2760 = vpow2.f32 %v1933_v21 }
 0x8a9   :  { %v2751_v22 = vpop.eup %2750  ;;  %v1887_v25 = vpop.xlane.xlu0 %1886 }
 0x8aa   :  { %v2028_v27 = vsel %vm237_vm1, %v2751_v22, 0.0  ;;  %2762 = vpow2.f32 %v1927_v23  ;;  %v1929_v31 = vmul.f32 1.442695, %v1908_v24  ;;  %v1960_v35 = vmul.f32 %v2751_v22, %v3489_v38 }
 0x8ab   :  { %v2753_v36 = vpop.eup %2752  ;;  %v1890_v28 = vpop.xlane.xlu1 %1889  ;;  %2029 = vadd.xlane.f32.xlu0 %v2028_v27  ;;  %v1913_v26 = vsub.f32 %v3441_v30, %v1887_v25 }
 0x8ac   :  { %v2022_v37 = vsel %vm237_vm1, %v2753_v36, 0.0  ;;  %v1958_v40 = vmul.f32 %v2753_v36, %v3489_v38  ;;  %2764 = vpow2.f32 %v1929_v31  ;;  %v1980_v17 = vsel %vm237_vm1, %v1960_v35, 0.0 }
 0x8ad   :  { %v2755_v29 = vpop.eup %2754  ;;  %v1881_v32 = vpop.xlane.xlu0 %1880  ;;  %v1914_v47 = vsub.f32 %v3449_v43, %v1890_v28  ;;  %v1939_v50 = vmul.f32 1.442695, %v1913_v26 }
 0x8ae   :  { %v2031_v34 = vsel %vm237_vm1, %v2755_v29, 0.0  ;;  %v1974_v46 = vsel %vm237_vm1, %v1958_v40, 0.0  ;;  %v1911_v52 = vsub.f32 %v3447_v44, %v1881_v32  ;;  %v1961_v59 = vmul.f32 %v2755_v29, %v3489_v38 }
 0x8af   :  { %2032 = vadd.xlane.f32.xlu1 %v2031_v34  ;;  %2023 = vadd.xlane.f32.xlu0 %v2022_v37  ;;  %v1884_v42 = vpop.xlane.xlu1 %1883  ;;  %v2757_v39 = vpop.eup %2756  ;;  %v1941_v63 = vmul.f32 1.442695, %v1914_v47  ;;  %2766 = vpow2.f32 %v1939_v50 }
 0x8b0   :  { %v2025_v45 = vsel %vm237_vm1, %v2757_v39, 0.0  ;;  %v1959_v51 = vmul.f32 %v2757_v39, %v3489_v38  ;;  %v1912_v0 = vsub.f32 %v3453_v49, %v1884_v42  ;;  %v1935_v43 = vmul.f32 1.442695, %v1911_v52 }
 0x8b1   :  { %v1893_v33 = vpop.xlane.xlu0 %1892  ;;  %v1983_v5 = vsel %vm237_vm1, %v1961_v59, 0.0  ;;  %2768 = vpow2.f32 %v1941_v63 }
 0x8b2   :  { %v1977_v56 = vsel %vm237_vm1, %v1959_v51, 0.0  ;;  %v1937_v62 = vmul.f32 1.442695, %v1912_v0  ;;  %2770 = vpow2.f32 %v1935_v43  ;;  %v1915_v3 = vsub.f32 %v3459_v54, %v1893_v33 }
 0x8b3   :  { %v2759_v48 = vpop.eup %2758  ;;  %1975 = vadd.xlane.f32.xlu1 %v1974_v46  ;;  %1981 = vadd.xlane.f32.xlu0 %v1980_v17 }
 0x8b4   :  { %v2040_v30 = vsel %vm237_vm1, %v2759_v48, 0.0  ;;  %v1964_v49 = vmul.f32 %v2759_v48, %v3489_v38  ;;  %2772 = vpow2.f32 %v1937_v62  ;;  %v1943_v10 = vmul.f32 1.442695, %v1915_v3 }
 0x8b5   :  { %v1896_v41 = vpop.xlane.xlu1 %1895  ;;  %v1899_v57 = vpop.xlane.xlu0 %1898 }
 0x8b6   :  { %v2761_v58 = vpop.eup %2760  ;;  %v1917_v44 = vsub.f32 %v3463_v53, %v1899_v57  ;;  %v1916_v1 = vsub.f32 %v3467_v55, %v1896_v41  ;;  %v1992_v6 = vsel %vm237_vm1, %v1964_v49, 0.0 }
 0x8b7   :  { %2026 = vadd.xlane.f32.xlu1 %v2025_v45  ;;  %2041 = vadd.xlane.f32.xlu0 %v2040_v30  ;;  %v2763_v60 = vpop.eup %2762  ;;  %v2043_v4 = vsel %vm237_vm1, %v2761_v58, 0.0  ;;  %v1965_v54 = vmul.f32 %v2761_v58, %v3489_v38 }
 0x8b8   :  { %v1947_v7 = vmul.f32 1.442695, %v1917_v44  ;;  %v2034_v53 = vsel %vm237_vm1, %v2763_v60, 0.0  ;;  %v1945_v19 = vmul.f32 1.442695, %v1916_v1 }
 0x8b9   :  { %v1902_v8 = vpop.xlane.xlu1 %1901  ;;  %v2765_v9 = vpop.eup %2764  ;;  %v1995_v15 = vsel %vm237_vm1, %v1965_v54, 0.0 }
 0x8ba   :  { %v1918_v2 = vsub.f32 %v3469_v61, %v1902_v8  ;;  %2774 = vpow2.f32 %v1947_v7  ;;  %v2037_v14 = vsel %vm237_vm1, %v2765_v9, 0.0  ;;  %v1962_v61 = vmul.f32 %v2763_v60, %v3489_v38 }
 0x8bb   :  { %1984 = vadd.xlane.f32.xlu1 %v1983_v5  ;;  %1978 = vadd.xlane.f32.xlu0 %v1977_v56  ;;  %2776 = vpow2.f32 %v1943_v10  ;;  %v1963_v55 = vmul.f32 %v2765_v9, %v3489_v38 }
 0x8bc   :  { %v1949_v11 = vmul.f32 1.442695, %v1918_v2  ;;  %v1986_v16 = vsel %vm237_vm1, %v1962_v61, 0.0  ;;  %v2767_v18 = vpop.eup %2766 }
 0x8bd   :  { %v1989_v22 = vsel %vm237_vm1, %v1963_v55, 0.0  ;;  %v2052_v23 = vsel %vm237_vm1, %v2767_v18, 0.0  ;;  %v1968_v39 = vmul.f32 %v2767_v18, %v3489_v38 }
 0x8be   :  { %2778 = vpow2.f32 %v1949_v11  ;;  %v2769_v20 = vpop.eup %2768 }
 0x8bf   :  { %2044 = vadd.xlane.f32.xlu1 %v2043_v4  ;;  %2035 = vadd.xlane.f32.xlu0 %v2034_v53  ;;  %v2771_v21 = vpop.eup %2770  ;;  %2780 = vpow2.f32 %v1945_v19  ;;  %v2055_v25 = vsel %vm237_vm1, %v2769_v20, 0.0  ;;  %v2004_v17 = vsel %vm237_vm1, %v1968_v39, 0.0  ;;  %v1969_v48 = vmul.f32 %v2769_v20, %v3489_v38 }
 0x8c0   :  { %v2046_v27 = vsel %vm237_vm1, %v2771_v21, 0.0  ;;  %v1966_v40 = vmul.f32 %v2771_v21, %v3489_v38  ;;  %v3551_v4 = vand.u32 127, %v371_v12 }
 0x8c1   :  { %v2773_v24 = vpop.eup %2772  ;;  %v2007_v50 = vsel %vm237_vm1, %v1969_v48, 0.0 }
 0x8c2   :  { %v2049_v29 = vsel %vm237_vm1, %v2773_v24, 0.0  ;;  %v1998_v42 = vsel %vm237_vm1, %v1966_v40, 0.0  ;;  %v1967_v33 = vmul.f32 %v2773_v24, %v3489_v38  ;;  %v2124_v53 = vadd.s32 4294967288, %v3551_v4 }
 0x8c3   :  { %2038 = vadd.xlane.f32.xlu1 %v2037_v14  ;;  %1993 = vadd.xlane.f32.xlu0 %v1992_v6  ;;  %v2131_v14 = vadd.s32 4294967280, %v3551_v4  ;;  %v2122_v12 = vsub.s32 %v3551_v4, %v3019_v13  ;;  %v2138_v55 = vadd.s32 4294967272, %v3551_v4  ;;  %v2145_v20 = vadd.s32 4294967264, %v3551_v4 }
 0x8c4   :  { %v2001_v46 = vsel %vm237_vm1, %v1967_v33, 0.0  ;;  %v2127_v54 = vsub.s32 %v2124_v53, %v3019_v13  ;;  %v2152_v21 = vadd.s32 4294967256, %v3551_v4  ;;  %v2159_v33 = vadd.s32 4294967248, %v3551_v4 }
 0x8c5   :  { %v2166_v48 = vadd.s32 4294967240, %v3551_v4 }
 0x8c7   :  { %1996 = vadd.xlane.f32.xlu1 %v1995_v15  ;;  %1987 = vadd.xlane.f32.xlu0 %v1986_v16  ;;  %v2775_v36 = vpop.eup %2774 }
 0x8c8   :  { %v2777_v28 = vpop.eup %2776  ;;  %v2064_v31 = vsel %vm237_vm1, %v2775_v36, 0.0  ;;  %v1972_v45 = vmul.f32 %v2775_v36, %v3489_v38 }
 0x8c9   :  { %v2058_v37 = vsel %vm237_vm1, %v2777_v28, 0.0  ;;  %v1970_v47 = vmul.f32 %v2777_v28, %v3489_v38 }
 0x8ca   :  { %v2016_v59 = vsel %vm237_vm1, %v1972_v45, 0.0 }
 0x8cb   :  { %1990 = vadd.xlane.f32.xlu1 %v1989_v22  ;;  %2053 = vadd.xlane.f32.xlu0 %v2052_v23  ;;  %v2779_v32 = vpop.eup %2778  ;;  %v2010_v52 = vsel %vm237_vm1, %v1970_v47, 0.0 }
 0x8cc   :  { %v2067_v34 = vsel %vm237_vm1, %v2779_v32, 0.0  ;;  %v2781_v35 = vpop.eup %2780  ;;  %v1973_v51 = vmul.f32 %v2779_v32, %v3489_v38  ;;  %v2148_v32 = vsub.s32 %v2145_v20, %v3019_v13 }
 0x8cd   :  { %v2061_v26 = vsel %vm237_vm1, %v2781_v35, 0.0  ;;  %v1971_v41 = vmul.f32 %v2781_v35, %v3489_v38 }
 0x8ce   :  { %v2019_v57 = vsel %vm237_vm1, %v1973_v51, 0.0 }
 0x8cf   :  { %2056 = vadd.xlane.f32.xlu1 %v2055_v25  ;;  %2047 = vadd.xlane.f32.xlu0 %v2046_v27  ;;  %v2013_v30 = vsel %vm237_vm1, %v1971_v41, 0.0  ;;  %v2134_v25 = vsub.s32 %v2131_v14, %v3019_v13  ;;  %vm2227_vm1 = vcmask 1048512  }
 0x8d3   :  { %2050 = vadd.xlane.f32.xlu1 %v2049_v29  ;;  %2065 = vadd.xlane.f32.xlu0 %v2064_v31  ;;  %v2141_v31 = vsub.s32 %v2138_v55, %v3019_v13 }
 0x8d7   :  { %2068 = vadd.xlane.f32.xlu1 %v2067_v34  ;;  %2059 = vadd.xlane.f32.xlu0 %v2058_v37  ;;  %v2155_v37 = vsub.s32 %v2152_v21, %v3019_v13 }
 0x8db   :  { %2062 = vadd.xlane.f32.xlu1 %v2061_v26  ;;  %1999 = vadd.xlane.f32.xlu0 %v1998_v42 }
 0x8df   :  { %2002 = vadd.xlane.f32.xlu1 %v2001_v46  ;;  %2005 = vadd.xlane.f32.xlu0 %v2004_v17 }
 0x8e3   :  { %2008 = vadd.xlane.f32.xlu1 %v2007_v50  ;;  %2011 = vadd.xlane.f32.xlu0 %v2010_v52  ;;  %v2173_v52 = vadd.s32 4294967232, %v3551_v4 }
 0x8e7   :  { %2014 = vadd.xlane.f32.xlu1 %v2013_v30  ;;  %2017 = vadd.xlane.f32.xlu0 %v2016_v59  ;;  %v2162_v59 = vsub.s32 %v2159_v33, %v3019_v13 }
 0x8eb   :  { %2020 = vadd.xlane.f32.xlu1 %v2019_v57 }
 0x934   :  { %v2030_v63 = vpop.xlane.xlu0 %2029 }
 0x938   :  { %v2033_v0 = vpop.xlane.xlu1 %2032  ;;  %v2024_v58 = vpop.xlane.xlu0 %2023 }
 0x93c   :  { %v1976_v43 = vpop.xlane.xlu1 %1975  ;;  %v1982_v60 = vpop.xlane.xlu0 %1981 }
 0x940   :  { %v2027_v44 = vpop.xlane.xlu1 %2026  ;;  %v2042_v5 = vpop.xlane.xlu0 %2041 }
 0x941   :  { %2782 = vrcp.f32 %v2027_v44 }
 0x942   :  { %2784 = vrcp.f32 %v2024_v58  ;;  %v2180_v58 = vadd.s32 4294967224, %v3551_v4 }
 0x943   :  { %2786 = vrcp.f32 %v2030_v63 }
 0x944   :  { %v1985_v56 = vpop.xlane.xlu1 %1984  ;;  %v1979_v8 = vpop.xlane.xlu0 %1978  ;;  %2788 = vrcp.f32 %v2033_v0 }
 0x948   :  { %v2045_v62 = vpop.xlane.xlu1 %2044  ;;  %v2036_v3 = vpop.xlane.xlu0 %2035 }
 0x949   :  { %2790 = vrcp.f32 %v2036_v3  ;;  %v2194_v3 = vadd.s32 4294967208, %v3551_v4 }
 0x94c   :  { %v2039_v38 = vpop.xlane.xlu1 %2038  ;;  %v3546_v49 = vpop.xlane.xlu0 %1993 }
 0x94d   :  { %2792 = vrcp.f32 %v2039_v38 }
 0x94e   :  { %v2783_v9 = vpop.eup %2782  ;;  %2794 = vrcp.f32 %v2042_v5  ;;  %v2176_v5 = vsub.s32 %v2173_v52, %v3019_v13 }
 0x94f   :  { %v2785_v6 = vpop.eup %2784  ;;  %v2073_v11 = vmul.f32 %v2783_v9, %v1979_v8  ;;  %2796 = vrcp.f32 %v2045_v62 }
 0x950   :  { %v3548_v7 = vpop.xlane.xlu1 %1996  ;;  %v1988_v2 = vpop.xlane.xlu0 %1987  ;;  %v2071_v16 = vmul.f32 %v2785_v6, %v1976_v43  ;;  %v2187_v43 = vadd.s32 4294967216, %v3551_v4 }
 0x951   :  { %v2787_v15 = vpop.eup %2786  ;;  %v2128_v23 = vrot.slane %v2073_v11, %v2127_v54 }
 0x952   :  { %v2789_v18 = vpop.eup %2788  ;;  %v2075_v27 = vmul.f32 %v2787_v15, %v1982_v60  ;;  %v2123_v29 = vrot.slane %v2071_v16, %v2122_v12  ;;  %v2169_v60 = vsub.s32 %v2166_v48, %v3019_v13  ;;  %v2197_v15 = vsub.s32 %v2194_v3, %v3019_v13 }
 0x953   :  { %v2077_v40 = vmul.f32 %v2789_v18, %v1985_v56 }
 0x954   :  { %v1991_v10 = vpop.xlane.xlu1 %1990  ;;  %v2054_v1 = vpop.xlane.xlu0 %2053  ;;  %v2130_v35 = vsel %vm2129_vm3, %v2128_v23, %v2123_v29  ;;  %v2135_v42 = vrot.slane %v2075_v27, %v2134_v25  ;;  %v2215_v27 = vadd.s32 4294967184, %v3551_v4 }
 0x955   :  { %v2142_v41 = vrot.slane %v2077_v40, %v2141_v31  ;;  %v2222_v31 = vadd.s32 4294967176, %v3551_v4 }
 0x956   :  { %v2791_v22 = vpop.eup %2790  ;;  %v2137_v47 = vsel %vm2136_vm4, %v2135_v42, %v2130_v35 }
 0x957   :  { %v2079_v34 = vmul.f32 %v2791_v22, %v1988_v2  ;;  %v2144_v0 = vsel %vm2143_vm5, %v2142_v41, %v2137_v47  ;;  %v2208_v22 = vadd.s32 4294967192, %v3551_v4  ;;  %v2225_v47 = vsub.s32 %v2222_v31, %v3019_v13 }
 0x958   :  { %v2057_v61 = vpop.xlane.xlu1 %2056  ;;  %v2048_v19 = vpop.xlane.xlu0 %2047 }
 0x959   :  { %2798 = vrcp.f32 %v2048_v19  ;;  %v2149_v50 = vrot.slane %v2079_v34, %v2148_v32 }
 0x95a   :  { %v2793_v24 = vpop.eup %2792  ;;  %2800 = vrcp.f32 %v2054_v1  ;;  %v2190_v1 = vsub.s32 %v2187_v43, %v3019_v13 }
 0x95b   :  { %v2081_v26 = vmul.f32 %v2793_v24, %v1991_v10  ;;  %v2795_v17 = vpop.eup %2794  ;;  %v2151_v44 = vsel %vm2150_vm6, %v2149_v50, %v2144_v0  ;;  %v2183_v10 = vsub.s32 %v2180_v58, %v3019_v13 }
 0x95c   :  { %v2051_v36 = vpop.xlane.xlu1 %2050  ;;  %v2066_v28 = vpop.xlane.xlu0 %2065  ;;  %v2083_v51 = vmul.f32 %v2795_v17, %v3546_v49 }
 0x95d   :  { %2802 = vrcp.f32 %v2051_v36  ;;  %v2156_v45 = vrot.slane %v2081_v26, %v2155_v37  ;;  %v2797_v30 = vpop.eup %2796  ;;  %v2211_v26 = vsub.s32 %v2208_v22, %v3019_v13 }
 0x95e   :  { %2804 = vrcp.f32 %v2057_v61  ;;  %v2085_v8 = vmul.f32 %v2797_v30, %v3548_v7  ;;  %v2163_v38 = vrot.slane %v2083_v51, %v2162_v59  ;;  %v2201_v7 = vadd.s32 4294967200, %v3551_v4 }
 0x95f   :  { %v2158_v62 = vsel %vm2157_vm7, %v2156_v45, %v2151_v44 }
 0x960   :  { %v2069_v39 = vpop.xlane.xlu1 %2068  ;;  %v2060_v46 = vpop.xlane.xlu0 %2059  ;;  %v2165_v54 = vsel %vm2164_vm8, %v2163_v38, %v2158_v62  ;;  %v2170_v61 = vrot.slane %v2085_v8, %v2169_v60  ;;  %v2204_v25 = vsub.s32 %v2201_v7, %v3019_v13 }
 0x961   :  { %2806 = vrcp.f32 %v2060_v46 }
 0x962   :  { %2808 = vrcp.f32 %v2066_v28  ;;  %v2172_v18 = vsel %vm2171_vm9, %v2170_v61, %v2165_v54 }
 0x964   :  { %v2063_v57 = vpop.xlane.xlu1 %2062  ;;  %v2000_v63 = vpop.xlane.xlu0 %1999 }
 0x965   :  { %2810 = vrcp.f32 %v2063_v57 }
 0x966   :  { %v2799_v56 = vpop.eup %2798  ;;  %2812 = vrcp.f32 %v2069_v39  ;;  %v2218_v39 = vsub.s32 %v2215_v27, %v3019_v13 }
 0x967   :  { %v2087_v49 = vmul.f32 %v2799_v56, %v2000_v63  ;;  %v2801_v9 = vpop.eup %2800 }
 0x968   :  { %v2003_v2 = vpop.xlane.xlu1 %2002  ;;  %v2006_v53 = vpop.xlane.xlu0 %2005 }
 0x969   :  { %v2177_v11 = vrot.slane %v2087_v49, %v2176_v5  ;;  %v2091_v14 = vmul.f32 %v2801_v9, %v2006_v53 }
 0x96a   :  { %v2803_v6 = vpop.eup %2802 }
 0x96b   :  { %v2089_v19 = vmul.f32 %v2803_v6, %v2003_v2  ;;  %v2805_v12 = vpop.eup %2804  ;;  %v2179_v23 = vsel %vm2178_vm10, %v2177_v11, %v2172_v18  ;;  %v2191_v24 = vrot.slane %v2091_v14, %v2190_v1 }
 0x96c   :  { %v2009_v16 = vpop.xlane.xlu1 %2008  ;;  %v2012_v55 = vpop.xlane.xlu0 %2011 }
 0x96d   :  { %v2184_v20 = vrot.slane %v2089_v19, %v2183_v10  ;;  %v2093_v21 = vmul.f32 %v2805_v12, %v2009_v16 }
 0x96e   :  { %v2807_v36 = vpop.eup %2806 }
 0x96f   :  { %v2186_v28 = vsel %vm2185_vm11, %v2184_v20, %v2179_v23  ;;  %v2198_v29 = vrot.slane %v2093_v21, %v2197_v15  ;;  %v2095_v34 = vmul.f32 %v2807_v36, %v2012_v55  ;;  %v2809_v35 = vpop.eup %2808 }
 0x970   :  { %v2193_v32 = vsel %vm2192_vm12, %v2191_v24, %v2186_v28  ;;  %v2015_v37 = vpop.xlane.xlu1 %2014  ;;  %v2018_v40 = vpop.xlane.xlu0 %2017 }
 0x971   :  { %v2205_v33 = vrot.slane %v2095_v34, %v2204_v25  ;;  %v2099_v46 = vmul.f32 %v2809_v35, %v2018_v40  ;;  %v2200_v17 = vsel %vm2199_vm13, %v2198_v29, %v2193_v32 }
 0x972   :  { %v2811_v42 = vpop.eup %2810 }
 0x973   :  { %v2097_v48 = vmul.f32 %v2811_v42, %v2015_v37  ;;  %v2813_v50 = vpop.eup %2812  ;;  %v2207_v45 = vsel %vm2206_vm14, %v2205_v33, %v2200_v17  ;;  %v2219_v30 = vrot.slane %v2099_v46, %v2218_v39 }
 0x974   :  { %v2021_v4 = vpop.xlane.xlu1 %2020 }
 0x975   :  { %v2212_v52 = vrot.slane %v2097_v48, %v2211_v26  ;;  %v2101_v41 = vmul.f32 %v2813_v50, %v2021_v4 }
 0x977   :  { %v2214_v59 = vsel %vm2213_vm15, %v2212_v52, %v2207_v45  ;;  %v2226_v51 = vrot.slane %v2101_v41, %v2225_v47 }
 0x978   :  { %v2221_v57 = vsel %vm2220_vm0, %v2219_v30, %v2214_v59 }
 0x979   :  { %v2228_v63 = vsel %vm2227_vm1, %v2226_v51, %v2221_v57 }
 0x97a   :  { %2230 = vst [vmem:[%s3602_s10] sm:$0x1] %v2228_v63 }

</bundles_post_ra>
